<compile_context>
chip_gen: v7x
topology: tpu7x:2x2x1
jax: 0.10.0
libtpu: 0.0.40
codegen_flags: <defaults>
</compile_context>

<pallas_src>
import jax
import jax.numpy as jnp
from jax.experimental import pallas as pl
from jax.experimental.pallas import tpu as pltpu

HIDDEN = 64          # LSTM hidden size
H4 = 4 * HIDDEN      # fused gate width (256)

# ---- packed bf16 weight slab: 128 rows, lane offsets (all multiples of 128) ----
W_ROWS = 128
WO_IH0, WO_HH0, WO_IH1, WO_HH1 = 0, 256, 512, 768          # LSTM weights (width 256)
WO_F1, WO_F2 = 1024, 1152                                  # feature net (used width 32)
WO_HD1, WO_R2, WO_FIN = 1280, 1536, 1664                   # heads (160 / 32 / 128 used)
W_LANES = 1792

# ---- packed f32 bias slab: 1 row, lane offsets (all multiples of 128) ----------
BO_L0, BO_L1 = 0, 256                                      # LSTM biases (width 256)
BO_F1, BO_F2 = 512, 640                                    # feature net (width 32)
BO_HD1, BO_R2, BO_FIN = 768, 1024, 1152                    # heads (160 / 32 / 128)
BO_LANES = 1280


def business_kernel(x_ref, feat_ref, w_ref, b_ref, out_ref):
    B, T, Din = x_ref.shape
    Fdim = feat_ref.shape[-1]
    f32 = jnp.float32
    bf16 = jnp.bfloat16

    # ---------- static, tile-aligned slices of the packed parameter slabs ----
    wih0 = w_ref[0:Din,    WO_IH0:WO_IH0 + H4]      # (Din, 256) bf16
    whh0 = w_ref[0:HIDDEN, WO_HH0:WO_HH0 + H4]      # (64, 256)  bf16
    wih1 = w_ref[0:HIDDEN, WO_IH1:WO_IH1 + H4]      # (64, 256)  bf16
    whh1 = w_ref[0:HIDDEN, WO_HH1:WO_HH1 + H4]      # (64, 256)  bf16
    b0 = b_ref[:, BO_L0:BO_L0 + H4]                 # (1, 256) f32
    b1 = b_ref[:, BO_L1:BO_L1 + H4]                 # (1, 256) f32

    # ---------- layer-0 input projection for ALL timesteps (one matmul) ------
    xflat = x_ref[...].reshape(B * T, Din).astype(bf16)            # (B*T, Din)
    pre0 = (jnp.dot(xflat, wih0, preferred_element_type=f32) + b0
            ).reshape(B, T, H4)                                    # (B, T, 256)

    def cell(pre, c):
        # pre: (B, 256) fused pre-activations in PyTorch gate order i|f|g|o.
        sig_if = jax.nn.sigmoid(pre[:, 0:2 * HIDDEN])              # one 128-lane EUP op
        g = jnp.tanh(pre[:, 2 * HIDDEN:3 * HIDDEN])
        o = jax.nn.sigmoid(pre[:, 3 * HIDDEN:4 * HIDDEN])
        c_new = sig_if[:, HIDDEN:2 * HIDDEN] * c + sig_if[:, 0:HIDDEN] * g
        h_new = o * jnp.tanh(c_new)
        return h_new, c_new

    # ---------- 2-layer LSTM recurrence, fully unrolled (T small/static) -----
    c0 = jnp.zeros((B, HIDDEN), f32)
    c1 = jnp.zeros((B, HIDDEN), f32)
    h0_bf = None          # bf16 copy of h0 (matmul operand)
    h1 = None
    h1_contrib = None     # h1_prev @ Whh1, computed off the critical path
    for t in range(T):
        pre_t = pre0[:, t, :]                                      # (B, 256)
        if t == 0:
            g0 = pre_t                                             # h0_prev == 0
        else:
            g0 = pre_t + jnp.dot(h0_bf, whh0, preferred_element_type=f32)
        h0, c0 = cell(g0, c0)
        h0_bf = h0.astype(bf16)

        g1 = jnp.dot(h0_bf, wih1, preferred_element_type=f32) + b1
        if t > 0:
            g1 = g1 + h1_contrib                                   # h1_prev @ Whh1
        h1, c1 = cell(g1, c1)
        if t + 1 < T:
            # Only needed by layer 1 at step t+1 -> overlaps with next step's
            # layer-0 work instead of sitting on the serial chain.
            h1_contrib = jnp.dot(h1.astype(bf16), whh1,
                                 preferred_element_type=f32)
    lstm_features = h1                                             # lstm_out[:, -1, :]

    # ---------- feature network: feature_dim -> 32 -> 32 (ReLU) --------------
    wf1 = w_ref[0:Fdim, WO_F1:WO_F1 + 32]
    wf2 = w_ref[0:32,   WO_F2:WO_F2 + 32]
    bf1 = b_ref[:, BO_F1:BO_F1 + 32]
    bf2 = b_ref[:, BO_F2:BO_F2 + 32]
    feats = feat_ref[...].astype(bf16)
    f1 = jnp.maximum(jnp.dot(feats, wf1, preferred_element_type=f32) + bf1, 0.0)
    f2 = jnp.maximum(jnp.dot(f1.astype(bf16), wf2,
                             preferred_element_type=f32) + bf2, 0.0)

    # ---------- heads ---------------------------------------------------------
    combined = jnp.concatenate([lstm_features, f2], axis=1).astype(bf16)   # (B, 96)

    # stacked first layers of growth/risk/kpi heads: one (96, 160) matmul
    wh1 = w_ref[0:96, WO_HD1:WO_HD1 + 160]
    bh1 = b_ref[:, BO_HD1:BO_HD1 + 160]
    hall = jnp.maximum(jnp.dot(combined, wh1,
                               preferred_element_type=f32) + bh1, 0.0)
    g1h = hall[:, 0:64]       # growth hidden (64)
    r1h = hall[:, 64:128]     # risk hidden   (64)
    k1h = hall[:, 128:160]    # kpi hidden    (32)

    # risk second hidden: 64 -> 32 (ReLU)
    wr2 = w_ref[0:HIDDEN, WO_R2:WO_R2 + 32]
    br2 = b_ref[:, BO_R2:BO_R2 + 32]
    r2 = jnp.maximum(jnp.dot(r1h.astype(bf16), wr2,
                             preferred_element_type=f32) + br2, 0.0)

    # block-diagonal final projection -> single lane-dense (B, 128) output
    #   cols 0:36 growth, 36:39 risk, 39:43 kpi, rest zero padding
    wfin = w_ref[0:128, WO_FIN:WO_FIN + 128]
    bfin = b_ref[:, BO_FIN:BO_FIN + 128]
    pen = jnp.concatenate([g1h, r2, k1h], axis=1).astype(bf16)     # (B, 128)
    out_ref[...] = jnp.dot(pen, wfin, preferred_element_type=f32) + bfin


# ------------------------------ parameter packing -----------------------------

def _linear(key, in_dim, out_dim):
    kw, _ = jax.random.split(key)
    scale = (2.0 / (in_dim + out_dim)) ** 0.5
    w = jax.random.normal(kw, (out_dim, in_dim), jnp.float32) * scale   # PyTorch (out,in)
    b = jnp.zeros((1, out_dim), jnp.float32)
    return w.T, b


def _lstm_layer(key, in_dim, hidden):
    """Fused-gate LSTM weights: (in,4H), (H,4H), (1,4H); gate order i,f,g,o."""
    k1, k2, k3, k4 = jax.random.split(key, 4)
    s = 1.0 / (hidden ** 0.5)
    w_ih = jax.random.uniform(k1, (4 * hidden, in_dim), jnp.float32, -s, s)
    w_hh = jax.random.uniform(k2, (4 * hidden, hidden), jnp.float32, -s, s)
    b_ih = jax.random.uniform(k3, (4 * hidden,), jnp.float32, -s, s)
    b_hh = jax.random.uniform(k4, (4 * hidden,), jnp.float32, -s, s)
    return w_ih.T, w_hh.T, (b_ih + b_hh).reshape(1, 4 * hidden)


def init_params(key, temporal_dim=2, feature_dim=11):
    keys = jax.random.split(key, 11)
    wih0, whh0, b0 = _lstm_layer(keys[0], temporal_dim, HIDDEN)
    wih1, whh1, b1 = _lstm_layer(keys[1], HIDDEN, HIDDEN)

    wf1, bf1 = _linear(keys[2], feature_dim, 32)
    wf2, bf2 = _linear(keys[3], 32, 32)
    wg1, bg1 = _linear(keys[4], 96, 64)
    wg2, bg2 = _linear(keys[5], 64, 36)
    wr1, br1 = _linear(keys[6], 96, 64)
    wr2, br2 = _linear(keys[7], 64, 32)
    wr3, br3 = _linear(keys[8], 32, 3)
    wk1, bk1 = _linear(keys[9], 96, 32)
    wk2, bk2 = _linear(keys[10], 32, 4)

    # stacked first layers of the three heads: one (96, 160) matmul
    wh1 = jnp.concatenate([wg1, wr1, wk1], axis=1)     # (96, 160)
    bh1 = jnp.concatenate([bg1, br1, bk1], axis=1)     # (1, 160)

    # block-diagonal final projection + fused lane-dense bias
    #   pen layout: [growth_hidden(64) | risk_hidden2(32) | kpi_hidden(32)]
    #   out layout: [growth(36) | risk(3) | kpi(4) | pad(85)]
    wfin = jnp.zeros((128, 128), jnp.float32)
    wfin = wfin.at[0:64, 0:36].set(wg2)
    wfin = wfin.at[64:96, 36:39].set(wr3)
    wfin = wfin.at[96:128, 39:43].set(wk2)
    bfin = jnp.zeros((1, 128), jnp.float32)
    bfin = bfin.at[:, 0:36].set(bg2)
    bfin = bfin.at[:, 36:39].set(br3)
    bfin = bfin.at[:, 39:43].set(bk2)

    # ---- pack into ONE bf16 weight slab + ONE f32 bias slab (2 DMAs) --------
    # NOTE: bf16 weight storage changes numerics by ~1e-2 relative vs f32
    # (acceptable per review; matmuls still accumulate in f32).
    w = jnp.zeros((W_ROWS, W_LANES), jnp.float32)
    w = w.at[0:temporal_dim, WO_IH0:WO_IH0 + H4].set(wih0)
    w = w.at[0:HIDDEN, WO_HH0:WO_HH0 + H4].set(whh0)
    w = w.at[0:HIDDEN, WO_IH1:WO_IH1 + H4].set(wih1)
    w = w.at[0:HIDDEN, WO_HH1:WO_HH1 + H4].set(whh1)
    w = w.at[0:feature_dim, WO_F1:WO_F1 + 32].set(wf1)
    w = w.at[0:32, WO_F2:WO_F2 + 32].set(wf2)
    w = w.at[0:96, WO_HD1:WO_HD1 + 160].set(wh1)
    w = w.at[0:HIDDEN, WO_R2:WO_R2 + 32].set(wr2)
    w = w.at[0:128, WO_FIN:WO_FIN + 128].set(wfin)
    w_slab = w.astype(jnp.bfloat16)

    b = jnp.zeros((1, BO_LANES), jnp.float32)
    b = b.at[:, BO_L0:BO_L0 + H4].set(b0)
    b = b.at[:, BO_L1:BO_L1 + H4].set(b1)
    b = b.at[:, BO_F1:BO_F1 + 32].set(bf1)
    b = b.at[:, BO_F2:BO_F2 + 32].set(bf2)
    b = b.at[:, BO_HD1:BO_HD1 + 160].set(bh1)
    b = b.at[:, BO_R2:BO_R2 + 32].set(br2)
    b = b.at[:, BO_FIN:BO_FIN + 128].set(bfin)
    return w_slab, b


# ---------------------------------- wrapper -----------------------------------

def business_model_forward(temporal_data, features, params):
    """temporal_data: (B, T, temporal_dim)   features: (B, feature_dim)"""
    w_slab, b_slab = params
    B = temporal_data.shape[0]

    vmem = pl.BlockSpec(memory_space=pltpu.MemorySpace.VMEM)
    # TODO(synk): for large serving batches, add a batch grid axis with
    # dimension_semantics=("parallel",) so v7x's second TensorCore is used.
    out = pl.pallas_call(
        business_kernel,
        out_shape=jax.ShapeDtypeStruct((B, 128), jnp.float32),   # lane-dense fused slab
        in_specs=[vmem, vmem, vmem, vmem],
        out_specs=vmem,
    )(temporal_data.astype(jnp.float32), features.astype(jnp.float32),
      w_slab, b_slab)

    growth = out[:, 0:36]
    # TODO(synk): dropout layers are inference no-ops and are intentionally omitted.
    return {
        'growth_predictions': {
            'absolute': growth[:, :12],
            'relative': growth[:, 12:24],
            'log': growth[:, 24:],
        },
        'risk_analysis': out[:, 36:39],
        'kpi_metrics': out[:, 39:43],
    }


if __name__ == "__main__":
    key = jax.random.PRNGKey(0)
    k_param, k_x, k_f = jax.random.split(key, 3)

    B, T, temporal_dim, feature_dim = 2, 8, 2, 11
    params = init_params(k_param, temporal_dim=temporal_dim, feature_dim=feature_dim)
    temporal_data = jax.random.normal(k_x, (B, T, temporal_dim), jnp.float32)
    features = jax.random.normal(k_f, (B, feature_dim), jnp.float32)

    out = business_model_forward(temporal_data, features, params)
    out = jax.block_until_ready(out)

    assert out['growth_predictions']['absolute'].shape == (B, 12)
    assert out['growth_predictions']['relative'].shape == (B, 12)
    assert out['growth_predictions']['log'].shape == (B, 12)
    assert out['risk_analysis'].shape == (B, 3)
    assert out['kpi_metrics'].shape == (B, 4)
    print("KERNEL_OK")
</pallas_src>

<mosaic_0001>
module attributes {stable_mosaic.version = 11 : i64} {
  func.func @business_kernel(%arg0: memref<2x8x2xf32, #tpu.memory_space<vmem>>, %arg1: memref<2x11xf32, #tpu.memory_space<vmem>>, %arg2: memref<128x1792xbf16, #tpu.memory_space<vmem>>, %arg3: memref<1x1280xf32, #tpu.memory_space<vmem>>, %arg4: memref<2x128xf32, #tpu.memory_space<vmem>>) attributes {dimension_semantics = [], scalar_prefetch = 0 : i64, scratch_operands = 0 : i64, tpu.core_type = #tpu.core_type<tc>} {
    %c0 = arith.constant 0 : index
    %c0_0 = arith.constant 0 : index
    %0 = vector.load %arg2[%c0, %c0_0] : memref<128x1792xbf16, #tpu.memory_space<vmem>>, vector<2x256xbf16>
    %c0_1 = arith.constant 0 : index
    %c256 = arith.constant 256 : index
    %1 = vector.load %arg2[%c0_1, %c256] : memref<128x1792xbf16, #tpu.memory_space<vmem>>, vector<64x256xbf16>
    %c0_2 = arith.constant 0 : index
    %c512 = arith.constant 512 : index
    %2 = vector.load %arg2[%c0_2, %c512] : memref<128x1792xbf16, #tpu.memory_space<vmem>>, vector<64x256xbf16>
    %c0_3 = arith.constant 0 : index
    %c768 = arith.constant 768 : index
    %3 = vector.load %arg2[%c0_3, %c768] : memref<128x1792xbf16, #tpu.memory_space<vmem>>, vector<64x256xbf16>
    %c0_4 = arith.constant 0 : index
    %c0_5 = arith.constant 0 : index
    %4 = vector.load %arg3[%c0_4, %c0_5] : memref<1x1280xf32, #tpu.memory_space<vmem>>, vector<1x256xf32>
    %c0_6 = arith.constant 0 : index
    %c256_7 = arith.constant 256 : index
    %5 = vector.load %arg3[%c0_6, %c256_7] : memref<1x1280xf32, #tpu.memory_space<vmem>>, vector<1x256xf32>
    %c0_8 = arith.constant 0 : index
    %c0_9 = arith.constant 0 : index
    %c0_10 = arith.constant 0 : index
    %6 = vector.load %arg0[%c0_8, %c0_9, %c0_10] : memref<2x8x2xf32, #tpu.memory_space<vmem>>, vector<2x8x2xf32>
    %7 = vector.shape_cast %6 : vector<2x8x2xf32> to vector<16x2xf32>
    %8 = arith.truncf %7 : vector<16x2xf32> to vector<16x2xbf16>
    %cst = arith.constant dense<0.000000e+00> : vector<16x256xf32>
    %9 = tpu.matmul %8, %0, %cst {dimension_numbers = #tpu.dot_dimension_numbers<[1], [0], [0], [1], [0, 0, 1, 1], [], []>} : vector<16x2xbf16>, vector<2x256xbf16>, vector<16x256xf32> -> vector<16x256xf32>
    %10 = vector.broadcast %4 : vector<1x256xf32> to vector<16x256xf32>
    %11 = arith.addf %9, %10 : vector<16x256xf32>
    %12 = vector.shape_cast %11 : vector<16x256xf32> to vector<2x8x256xf32>
    %cst_11 = arith.constant 0.000000e+00 : f32
    %13 = vector.broadcast %cst_11 : f32 to vector<2x64xf32>
    %cst_12 = arith.constant 0.000000e+00 : f32
    %14 = vector.broadcast %cst_12 : f32 to vector<2x64xf32>
    %15 = vector.extract_strided_slice %12 {offsets = [0, 0, 0], sizes = [2, 1, 256], strides = [1, 1, 1]} : vector<2x8x256xf32> to vector<2x1x256xf32>
    %16 = vector.shape_cast %15 : vector<2x1x256xf32> to vector<2x256xf32>
    %17 = vector.extract_strided_slice %16 {offsets = [0, 0], sizes = [2, 128], strides = [1, 1]} : vector<2x256xf32> to vector<2x128xf32>
    %18 = arith.negf %17 : vector<2x128xf32>
    %19 = math.exp %18 : vector<2x128xf32>
    %cst_13 = arith.constant 1.000000e+00 : f32
    %20 = vector.broadcast %cst_13 : f32 to vector<2x128xf32>
    %21 = arith.addf %20, %19 : vector<2x128xf32>
    %22 = arith.divf %20, %21 : vector<2x128xf32>
    %23 = vector.extract_strided_slice %16 {offsets = [0, 128], sizes = [2, 64], strides = [1, 1]} : vector<2x256xf32> to vector<2x64xf32>
    %24 = math.tanh %23 : vector<2x64xf32>
    %25 = vector.extract_strided_slice %16 {offsets = [0, 192], sizes = [2, 64], strides = [1, 1]} : vector<2x256xf32> to vector<2x64xf32>
    %26 = arith.negf %25 : vector<2x64xf32>
    %27 = math.exp %26 : vector<2x64xf32>
    %cst_14 = arith.constant 1.000000e+00 : f32
    %28 = vector.broadcast %cst_14 : f32 to vector<2x64xf32>
    %29 = arith.addf %28, %27 : vector<2x64xf32>
    %30 = arith.divf %28, %29 : vector<2x64xf32>
    %31 = vector.extract_strided_slice %22 {offsets = [0, 64], sizes = [2, 64], strides = [1, 1]} : vector<2x128xf32> to vector<2x64xf32>
    %32 = arith.mulf %31, %13 : vector<2x64xf32>
    %33 = vector.extract_strided_slice %22 {offsets = [0, 0], sizes = [2, 64], strides = [1, 1]} : vector<2x128xf32> to vector<2x64xf32>
    %34 = arith.mulf %33, %24 : vector<2x64xf32>
    %35 = arith.addf %32, %34 : vector<2x64xf32>
    %36 = math.tanh %35 : vector<2x64xf32>
    %37 = arith.mulf %30, %36 : vector<2x64xf32>
    %38 = arith.truncf %37 : vector<2x64xf32> to vector<2x64xbf16>
    %cst_15 = arith.constant dense<0.000000e+00> : vector<2x256xf32>
    %39 = tpu.matmul %38, %2, %cst_15 {dimension_numbers = #tpu.dot_dimension_numbers<[1], [0], [0], [1], [0, 0, 1, 1], [], []>} : vector<2x64xbf16>, vector<64x256xbf16>, vector<2x256xf32> -> vector<2x256xf32>
    %40 = vector.broadcast %5 : vector<1x256xf32> to vector<2x256xf32>
    %41 = arith.addf %39, %40 : vector<2x256xf32>
    %42 = vector.extract_strided_slice %41 {offsets = [0, 0], sizes = [2, 128], strides = [1, 1]} : vector<2x256xf32> to vector<2x128xf32>
    %43 = arith.negf %42 : vector<2x128xf32>
    %44 = math.exp %43 : vector<2x128xf32>
    %cst_16 = arith.constant 1.000000e+00 : f32
    %45 = vector.broadcast %cst_16 : f32 to vector<2x128xf32>
    %46 = arith.addf %45, %44 : vector<2x128xf32>
    %47 = arith.divf %45, %46 : vector<2x128xf32>
    %48 = vector.extract_strided_slice %41 {offsets = [0, 128], sizes = [2, 64], strides = [1, 1]} : vector<2x256xf32> to vector<2x64xf32>
    %49 = math.tanh %48 : vector<2x64xf32>
    %50 = vector.extract_strided_slice %41 {offsets = [0, 192], sizes = [2, 64], strides = [1, 1]} : vector<2x256xf32> to vector<2x64xf32>
    %51 = arith.negf %50 : vector<2x64xf32>
    %52 = math.exp %51 : vector<2x64xf32>
    %cst_17 = arith.constant 1.000000e+00 : f32
    %53 = vector.broadcast %cst_17 : f32 to vector<2x64xf32>
    %54 = arith.addf %53, %52 : vector<2x64xf32>
    %55 = arith.divf %53, %54 : vector<2x64xf32>
    %56 = vector.extract_strided_slice %47 {offsets = [0, 64], sizes = [2, 64], strides = [1, 1]} : vector<2x128xf32> to vector<2x64xf32>
    %57 = arith.mulf %56, %14 : vector<2x64xf32>
    %58 = vector.extract_strided_slice %47 {offsets = [0, 0], sizes = [2, 64], strides = [1, 1]} : vector<2x128xf32> to vector<2x64xf32>
    %59 = arith.mulf %58, %49 : vector<2x64xf32>
    %60 = arith.addf %57, %59 : vector<2x64xf32>
    %61 = math.tanh %60 : vector<2x64xf32>
    %62 = arith.mulf %55, %61 : vector<2x64xf32>
    %63 = arith.truncf %62 : vector<2x64xf32> to vector<2x64xbf16>
    %cst_18 = arith.constant dense<0.000000e+00> : vector<2x256xf32>
    %64 = tpu.matmul %63, %3, %cst_18 {dimension_numbers = #tpu.dot_dimension_numbers<[1], [0], [0], [1], [0, 0, 1, 1], [], []>} : vector<2x64xbf16>, vector<64x256xbf16>, vector<2x256xf32> -> vector<2x256xf32>
    %65 = vector.extract_strided_slice %12 {offsets = [0, 1, 0], sizes = [2, 1, 256], strides = [1, 1, 1]} : vector<2x8x256xf32> to vector<2x1x256xf32>
    %66 = vector.shape_cast %65 : vector<2x1x256xf32> to vector<2x256xf32>
    %cst_19 = arith.constant dense<0.000000e+00> : vector<2x256xf32>
    %67 = tpu.matmul %38, %1, %cst_19 {dimension_numbers = #tpu.dot_dimension_numbers<[1], [0], [0], [1], [0, 0, 1, 1], [], []>} : vector<2x64xbf16>, vector<64x256xbf16>, vector<2x256xf32> -> vector<2x256xf32>
    %68 = arith.addf %66, %67 : vector<2x256xf32>
    %69 = vector.extract_strided_slice %68 {offsets = [0, 0], sizes = [2, 128], strides = [1, 1]} : vector<2x256xf32> to vector<2x128xf32>
    %70 = arith.negf %69 : vector<2x128xf32>
    %71 = math.exp %70 : vector<2x128xf32>
    %cst_20 = arith.constant 1.000000e+00 : f32
    %72 = vector.broadcast %cst_20 : f32 to vector<2x128xf32>
    %73 = arith.addf %72, %71 : vector<2x128xf32>
    %74 = arith.divf %72, %73 : vector<2x128xf32>
    %75 = vector.extract_strided_slice %68 {offsets = [0, 128], sizes = [2, 64], strides = [1, 1]} : vector<2x256xf32> to vector<2x64xf32>
    %76 = math.tanh %75 : vector<2x64xf32>
    %77 = vector.extract_strided_slice %68 {offsets = [0, 192], sizes = [2, 64], strides = [1, 1]} : vector<2x256xf32> to vector<2x64xf32>
    %78 = arith.negf %77 : vector<2x64xf32>
    %79 = math.exp %78 : vector<2x64xf32>
    %cst_21 = arith.constant 1.000000e+00 : f32
    %80 = vector.broadcast %cst_21 : f32 to vector<2x64xf32>
    %81 = arith.addf %80, %79 : vector<2x64xf32>
    %82 = arith.divf %80, %81 : vector<2x64xf32>
    %83 = vector.extract_strided_slice %74 {offsets = [0, 64], sizes = [2, 64], strides = [1, 1]} : vector<2x128xf32> to vector<2x64xf32>
    %84 = arith.mulf %83, %35 : vector<2x64xf32>
    %85 = vector.extract_strided_slice %74 {offsets = [0, 0], sizes = [2, 64], strides = [1, 1]} : vector<2x128xf32> to vector<2x64xf32>
    %86 = arith.mulf %85, %76 : vector<2x64xf32>
    %87 = arith.addf %84, %86 : vector<2x64xf32>
    %88 = math.tanh %87 : vector<2x64xf32>
    %89 = arith.mulf %82, %88 : vector<2x64xf32>
    %90 = arith.truncf %89 : vector<2x64xf32> to vector<2x64xbf16>
    %cst_22 = arith.constant dense<0.000000e+00> : vector<2x256xf32>
    %91 = tpu.matmul %90, %2, %cst_22 {dimension_numbers = #tpu.dot_dimension_numbers<[1], [0], [0], [1], [0, 0, 1, 1], [], []>} : vector<2x64xbf16>, vector<64x256xbf16>, vector<2x256xf32> -> vector<2x256xf32>
    %92 = vector.broadcast %5 : vector<1x256xf32> to vector<2x256xf32>
    %93 = arith.addf %91, %92 : vector<2x256xf32>
    %94 = arith.addf %93, %64 : vector<2x256xf32>
    %95 = vector.extract_strided_slice %94 {offsets = [0, 0], sizes = [2, 128], strides = [1, 1]} : vector<2x256xf32> to vector<2x128xf32>
    %96 = arith.negf %95 : vector<2x128xf32>
    %97 = math.exp %96 : vector<2x128xf32>
    %cst_23 = arith.constant 1.000000e+00 : f32
    %98 = vector.broadcast %cst_23 : f32 to vector<2x128xf32>
    %99 = arith.addf %98, %97 : vector<2x128xf32>
    %100 = arith.divf %98, %99 : vector<2x128xf32>
    %101 = vector.extract_strided_slice %94 {offsets = [0, 128], sizes = [2, 64], strides = [1, 1]} : vector<2x256xf32> to vector<2x64xf32>
    %102 = math.tanh %101 : vector<2x64xf32>
    %103 = vector.extract_strided_slice %94 {offsets = [0, 192], sizes = [2, 64], strides = [1, 1]} : vector<2x256xf32> to vector<2x64xf32>
    %104 = arith.negf %103 : vector<2x64xf32>
    %105 = math.exp %104 : vector<2x64xf32>
    %cst_24 = arith.constant 1.000000e+00 : f32
    %106 = vector.broadcast %cst_24 : f32 to vector<2x64xf32>
    %107 = arith.addf %106, %105 : vector<2x64xf32>
    %108 = arith.divf %106, %107 : vector<2x64xf32>
    %109 = vector.extract_strided_slice %100 {offsets = [0, 64], sizes = [2, 64], strides = [1, 1]} : vector<2x128xf32> to vector<2x64xf32>
    %110 = arith.mulf %109, %60 : vector<2x64xf32>
    %111 = vector.extract_strided_slice %100 {offsets = [0, 0], sizes = [2, 64], strides = [1, 1]} : vector<2x128xf32> to vector<2x64xf32>
    %112 = arith.mulf %111, %102 : vector<2x64xf32>
    %113 = arith.addf %110, %112 : vector<2x64xf32>
    %114 = math.tanh %113 : vector<2x64xf32>
    %115 = arith.mulf %108, %114 : vector<2x64xf32>
    %116 = arith.truncf %115 : vector<2x64xf32> to vector<2x64xbf16>
    %cst_25 = arith.constant dense<0.000000e+00> : vector<2x256xf32>
    %117 = tpu.matmul %116, %3, %cst_25 {dimension_numbers = #tpu.dot_dimension_numbers<[1], [0], [0], [1], [0, 0, 1, 1], [], []>} : vector<2x64xbf16>, vector<64x256xbf16>, vector<2x256xf32> -> vector<2x256xf32>
    %118 = vector.extract_strided_slice %12 {offsets = [0, 2, 0], sizes = [2, 1, 256], strides = [1, 1, 1]} : vector<2x8x256xf32> to vector<2x1x256xf32>
    %119 = vector.shape_cast %118 : vector<2x1x256xf32> to vector<2x256xf32>
    %cst_26 = arith.constant dense<0.000000e+00> : vector<2x256xf32>
    %120 = tpu.matmul %90, %1, %cst_26 {dimension_numbers = #tpu.dot_dimension_numbers<[1], [0], [0], [1], [0, 0, 1, 1], [], []>} : vector<2x64xbf16>, vector<64x256xbf16>, vector<2x256xf32> -> vector<2x256xf32>
    %121 = arith.addf %119, %120 : vector<2x256xf32>
    %122 = vector.extract_strided_slice %121 {offsets = [0, 0], sizes = [2, 128], strides = [1, 1]} : vector<2x256xf32> to vector<2x128xf32>
    %123 = arith.negf %122 : vector<2x128xf32>
    %124 = math.exp %123 : vector<2x128xf32>
    %cst_27 = arith.constant 1.000000e+00 : f32
    %125 = vector.broadcast %cst_27 : f32 to vector<2x128xf32>
    %126 = arith.addf %125, %124 : vector<2x128xf32>
    %127 = arith.divf %125, %126 : vector<2x128xf32>
    %128 = vector.extract_strided_slice %121 {offsets = [0, 128], sizes = [2, 64], strides = [1, 1]} : vector<2x256xf32> to vector<2x64xf32>
    %129 = math.tanh %128 : vector<2x64xf32>
    %130 = vector.extract_strided_slice %121 {offsets = [0, 192], sizes = [2, 64], strides = [1, 1]} : vector<2x256xf32> to vector<2x64xf32>
    %131 = arith.negf %130 : vector<2x64xf32>
    %132 = math.exp %131 : vector<2x64xf32>
    %cst_28 = arith.constant 1.000000e+00 : f32
    %133 = vector.broadcast %cst_28 : f32 to vector<2x64xf32>
    %134 = arith.addf %133, %132 : vector<2x64xf32>
    %135 = arith.divf %133, %134 : vector<2x64xf32>
    %136 = vector.extract_strided_slice %127 {offsets = [0, 64], sizes = [2, 64], strides = [1, 1]} : vector<2x128xf32> to vector<2x64xf32>
    %137 = arith.mulf %136, %87 : vector<2x64xf32>
    %138 = vector.extract_strided_slice %127 {offsets = [0, 0], sizes = [2, 64], strides = [1, 1]} : vector<2x128xf32> to vector<2x64xf32>
    %139 = arith.mulf %138, %129 : vector<2x64xf32>
    %140 = arith.addf %137, %139 : vector<2x64xf32>
    %141 = math.tanh %140 : vector<2x64xf32>
    %142 = arith.mulf %135, %141 : vector<2x64xf32>
    %143 = arith.truncf %142 : vector<2x64xf32> to vector<2x64xbf16>
    %cst_29 = arith.constant dense<0.000000e+00> : vector<2x256xf32>
    %144 = tpu.matmul %143, %2, %cst_29 {dimension_numbers = #tpu.dot_dimension_numbers<[1], [0], [0], [1], [0, 0, 1, 1], [], []>} : vector<2x64xbf16>, vector<64x256xbf16>, vector<2x256xf32> -> vector<2x256xf32>
    %145 = vector.broadcast %5 : vector<1x256xf32> to vector<2x256xf32>
    %146 = arith.addf %144, %145 : vector<2x256xf32>
    %147 = arith.addf %146, %117 : vector<2x256xf32>
    %148 = vector.extract_strided_slice %147 {offsets = [0, 0], sizes = [2, 128], strides = [1, 1]} : vector<2x256xf32> to vector<2x128xf32>
    %149 = arith.negf %148 : vector<2x128xf32>
    %150 = math.exp %149 : vector<2x128xf32>
    %cst_30 = arith.constant 1.000000e+00 : f32
    %151 = vector.broadcast %cst_30 : f32 to vector<2x128xf32>
    %152 = arith.addf %151, %150 : vector<2x128xf32>
    %153 = arith.divf %151, %152 : vector<2x128xf32>
    %154 = vector.extract_strided_slice %147 {offsets = [0, 128], sizes = [2, 64], strides = [1, 1]} : vector<2x256xf32> to vector<2x64xf32>
    %155 = math.tanh %154 : vector<2x64xf32>
    %156 = vector.extract_strided_slice %147 {offsets = [0, 192], sizes = [2, 64], strides = [1, 1]} : vector<2x256xf32> to vector<2x64xf32>
    %157 = arith.negf %156 : vector<2x64xf32>
    %158 = math.exp %157 : vector<2x64xf32>
    %cst_31 = arith.constant 1.000000e+00 : f32
    %159 = vector.broadcast %cst_31 : f32 to vector<2x64xf32>
    %160 = arith.addf %159, %158 : vector<2x64xf32>
    %161 = arith.divf %159, %160 : vector<2x64xf32>
    %162 = vector.extract_strided_slice %153 {offsets = [0, 64], sizes = [2, 64], strides = [1, 1]} : vector<2x128xf32> to vector<2x64xf32>
    %163 = arith.mulf %162, %113 : vector<2x64xf32>
    %164 = vector.extract_strided_slice %153 {offsets = [0, 0], sizes = [2, 64], strides = [1, 1]} : vector<2x128xf32> to vector<2x64xf32>
    %165 = arith.mulf %164, %155 : vector<2x64xf32>
    %166 = arith.addf %163, %165 : vector<2x64xf32>
    %167 = math.tanh %166 : vector<2x64xf32>
    %168 = arith.mulf %161, %167 : vector<2x64xf32>
    %169 = arith.truncf %168 : vector<2x64xf32> to vector<2x64xbf16>
    %cst_32 = arith.constant dense<0.000000e+00> : vector<2x256xf32>
    %170 = tpu.matmul %169, %3, %cst_32 {dimension_numbers = #tpu.dot_dimension_numbers<[1], [0], [0], [1], [0, 0, 1, 1], [], []>} : vector<2x64xbf16>, vector<64x256xbf16>, vector<2x256xf32> -> vector<2x256xf32>
    %171 = vector.extract_strided_slice %12 {offsets = [0, 3, 0], sizes = [2, 1, 256], strides = [1, 1, 1]} : vector<2x8x256xf32> to vector<2x1x256xf32>
    %172 = vector.shape_cast %171 : vector<2x1x256xf32> to vector<2x256xf32>
    %cst_33 = arith.constant dense<0.000000e+00> : vector<2x256xf32>
    %173 = tpu.matmul %143, %1, %cst_33 {dimension_numbers = #tpu.dot_dimension_numbers<[1], [0], [0], [1], [0, 0, 1, 1], [], []>} : vector<2x64xbf16>, vector<64x256xbf16>, vector<2x256xf32> -> vector<2x256xf32>
    %174 = arith.addf %172, %173 : vector<2x256xf32>
    %175 = vector.extract_strided_slice %174 {offsets = [0, 0], sizes = [2, 128], strides = [1, 1]} : vector<2x256xf32> to vector<2x128xf32>
    %176 = arith.negf %175 : vector<2x128xf32>
    %177 = math.exp %176 : vector<2x128xf32>
    %cst_34 = arith.constant 1.000000e+00 : f32
    %178 = vector.broadcast %cst_34 : f32 to vector<2x128xf32>
    %179 = arith.addf %178, %177 : vector<2x128xf32>
    %180 = arith.divf %178, %179 : vector<2x128xf32>
    %181 = vector.extract_strided_slice %174 {offsets = [0, 128], sizes = [2, 64], strides = [1, 1]} : vector<2x256xf32> to vector<2x64xf32>
    %182 = math.tanh %181 : vector<2x64xf32>
    %183 = vector.extract_strided_slice %174 {offsets = [0, 192], sizes = [2, 64], strides = [1, 1]} : vector<2x256xf32> to vector<2x64xf32>
    %184 = arith.negf %183 : vector<2x64xf32>
    %185 = math.exp %184 : vector<2x64xf32>
    %cst_35 = arith.constant 1.000000e+00 : f32
    %186 = vector.broadcast %cst_35 : f32 to vector<2x64xf32>
    %187 = arith.addf %186, %185 : vector<2x64xf32>
    %188 = arith.divf %186, %187 : vector<2x64xf32>
    %189 = vector.extract_strided_slice %180 {offsets = [0, 64], sizes = [2, 64], strides = [1, 1]} : vector<2x128xf32> to vector<2x64xf32>
    %190 = arith.mulf %189, %140 : vector<2x64xf32>
    %191 = vector.extract_strided_slice %180 {offsets = [0, 0], sizes = [2, 64], strides = [1, 1]} : vector<2x128xf32> to vector<2x64xf32>
    %192 = arith.mulf %191, %182 : vector<2x64xf32>
    %193 = arith.addf %190, %192 : vector<2x64xf32>
    %194 = math.tanh %193 : vector<2x64xf32>
    %195 = arith.mulf %188, %194 : vector<2x64xf32>
    %196 = arith.truncf %195 : vector<2x64xf32> to vector<2x64xbf16>
    %cst_36 = arith.constant dense<0.000000e+00> : vector<2x256xf32>
    %197 = tpu.matmul %196, %2, %cst_36 {dimension_numbers = #tpu.dot_dimension_numbers<[1], [0], [0], [1], [0, 0, 1, 1], [], []>} : vector<2x64xbf16>, vector<64x256xbf16>, vector<2x256xf32> -> vector<2x256xf32>
    %198 = vector.broadcast %5 : vector<1x256xf32> to vector<2x256xf32>
    %199 = arith.addf %197, %198 : vector<2x256xf32>
    %200 = arith.addf %199, %170 : vector<2x256xf32>
    %201 = vector.extract_strided_slice %200 {offsets = [0, 0], sizes = [2, 128], strides = [1, 1]} : vector<2x256xf32> to vector<2x128xf32>
    %202 = arith.negf %201 : vector<2x128xf32>
    %203 = math.exp %202 : vector<2x128xf32>
    %cst_37 = arith.constant 1.000000e+00 : f32
    %204 = vector.broadcast %cst_37 : f32 to vector<2x128xf32>
    %205 = arith.addf %204, %203 : vector<2x128xf32>
    %206 = arith.divf %204, %205 : vector<2x128xf32>
    %207 = vector.extract_strided_slice %200 {offsets = [0, 128], sizes = [2, 64], strides = [1, 1]} : vector<2x256xf32> to vector<2x64xf32>
    %208 = math.tanh %207 : vector<2x64xf32>
    %209 = vector.extract_strided_slice %200 {offsets = [0, 192], sizes = [2, 64], strides = [1, 1]} : vector<2x256xf32> to vector<2x64xf32>
    %210 = arith.negf %209 : vector<2x64xf32>
    %211 = math.exp %210 : vector<2x64xf32>
    %cst_38 = arith.constant 1.000000e+00 : f32
    %212 = vector.broadcast %cst_38 : f32 to vector<2x64xf32>
    %213 = arith.addf %212, %211 : vector<2x64xf32>
    %214 = arith.divf %212, %213 : vector<2x64xf32>
    %215 = vector.extract_strided_slice %206 {offsets = [0, 64], sizes = [2, 64], strides = [1, 1]} : vector<2x128xf32> to vector<2x64xf32>
    %216 = arith.mulf %215, %166 : vector<2x64xf32>
    %217 = vector.extract_strided_slice %206 {offsets = [0, 0], sizes = [2, 64], strides = [1, 1]} : vector<2x128xf32> to vector<2x64xf32>
    %218 = arith.mulf %217, %208 : vector<2x64xf32>
    %219 = arith.addf %216, %218 : vector<2x64xf32>
    %220 = math.tanh %219 : vector<2x64xf32>
    %221 = arith.mulf %214, %220 : vector<2x64xf32>
    %222 = arith.truncf %221 : vector<2x64xf32> to vector<2x64xbf16>
    %cst_39 = arith.constant dense<0.000000e+00> : vector<2x256xf32>
    %223 = tpu.matmul %222, %3, %cst_39 {dimension_numbers = #tpu.dot_dimension_numbers<[1], [0], [0], [1], [0, 0, 1, 1], [], []>} : vector<2x64xbf16>, vector<64x256xbf16>, vector<2x256xf32> -> vector<2x256xf32>
    %224 = vector.extract_strided_slice %12 {offsets = [0, 4, 0], sizes = [2, 1, 256], strides = [1, 1, 1]} : vector<2x8x256xf32> to vector<2x1x256xf32>
    %225 = vector.shape_cast %224 : vector<2x1x256xf32> to vector<2x256xf32>
    %cst_40 = arith.constant dense<0.000000e+00> : vector<2x256xf32>
    %226 = tpu.matmul %196, %1, %cst_40 {dimension_numbers = #tpu.dot_dimension_numbers<[1], [0], [0], [1], [0, 0, 1, 1], [], []>} : vector<2x64xbf16>, vector<64x256xbf16>, vector<2x256xf32> -> vector<2x256xf32>
    %227 = arith.addf %225, %226 : vector<2x256xf32>
    %228 = vector.extract_strided_slice %227 {offsets = [0, 0], sizes = [2, 128], strides = [1, 1]} : vector<2x256xf32> to vector<2x128xf32>
    %229 = arith.negf %228 : vector<2x128xf32>
    %230 = math.exp %229 : vector<2x128xf32>
    %cst_41 = arith.constant 1.000000e+00 : f32
    %231 = vector.broadcast %cst_41 : f32 to vector<2x128xf32>
    %232 = arith.addf %231, %230 : vector<2x128xf32>
    %233 = arith.divf %231, %232 : vector<2x128xf32>
    %234 = vector.extract_strided_slice %227 {offsets = [0, 128], sizes = [2, 64], strides = [1, 1]} : vector<2x256xf32> to vector<2x64xf32>
    %235 = math.tanh %234 : vector<2x64xf32>
    %236 = vector.extract_strided_slice %227 {offsets = [0, 192], sizes = [2, 64], strides = [1, 1]} : vector<2x256xf32> to vector<2x64xf32>
    %237 = arith.negf %236 : vector<2x64xf32>
    %238 = math.exp %237 : vector<2x64xf32>
    %cst_42 = arith.constant 1.000000e+00 : f32
    %239 = vector.broadcast %cst_42 : f32 to vector<2x64xf32>
    %240 = arith.addf %239, %238 : vector<2x64xf32>
    %241 = arith.divf %239, %240 : vector<2x64xf32>
    %242 = vector.extract_strided_slice %233 {offsets = [0, 64], sizes = [2, 64], strides = [1, 1]} : vector<2x128xf32> to vector<2x64xf32>
    %243 = arith.mulf %242, %193 : vector<2x64xf32>
    %244 = vector.extract_strided_slice %233 {offsets = [0, 0], sizes = [2, 64], strides = [1, 1]} : vector<2x128xf32> to vector<2x64xf32>
    %245 = arith.mulf %244, %235 : vector<2x64xf32>
    %246 = arith.addf %243, %245 : vector<2x64xf32>
    %247 = math.tanh %246 : vector<2x64xf32>
    %248 = arith.mulf %241, %247 : vector<2x64xf32>
    %249 = arith.truncf %248 : vector<2x64xf32> to vector<2x64xbf16>
    %cst_43 = arith.constant dense<0.000000e+00> : vector<2x256xf32>
    %250 = tpu.matmul %249, %2, %cst_43 {dimension_numbers = #tpu.dot_dimension_numbers<[1], [0], [0], [1], [0, 0, 1, 1], [], []>} : vector<2x64xbf16>, vector<64x256xbf16>, vector<2x256xf32> -> vector<2x256xf32>
    %251 = vector.broadcast %5 : vector<1x256xf32> to vector<2x256xf32>
    %252 = arith.addf %250, %251 : vector<2x256xf32>
    %253 = arith.addf %252, %223 : vector<2x256xf32>
    %254 = vector.extract_strided_slice %253 {offsets = [0, 0], sizes = [2, 128], strides = [1, 1]} : vector<2x256xf32> to vector<2x128xf32>
    %255 = arith.negf %254 : vector<2x128xf32>
    %256 = math.exp %255 : vector<2x128xf32>
    %cst_44 = arith.constant 1.000000e+00 : f32
    %257 = vector.broadcast %cst_44 : f32 to vector<2x128xf32>
    %258 = arith.addf %257, %256 : vector<2x128xf32>
    %259 = arith.divf %257, %258 : vector<2x128xf32>
    %260 = vector.extract_strided_slice %253 {offsets = [0, 128], sizes = [2, 64], strides = [1, 1]} : vector<2x256xf32> to vector<2x64xf32>
    %261 = math.tanh %260 : vector<2x64xf32>
    %262 = vector.extract_strided_slice %253 {offsets = [0, 192], sizes = [2, 64], strides = [1, 1]} : vector<2x256xf32> to vector<2x64xf32>
    %263 = arith.negf %262 : vector<2x64xf32>
    %264 = math.exp %263 : vector<2x64xf32>
    %cst_45 = arith.constant 1.000000e+00 : f32
    %265 = vector.broadcast %cst_45 : f32 to vector<2x64xf32>
    %266 = arith.addf %265, %264 : vector<2x64xf32>
    %267 = arith.divf %265, %266 : vector<2x64xf32>
    %268 = vector.extract_strided_slice %259 {offsets = [0, 64], sizes = [2, 64], strides = [1, 1]} : vector<2x128xf32> to vector<2x64xf32>
    %269 = arith.mulf %268, %219 : vector<2x64xf32>
    %270 = vector.extract_strided_slice %259 {offsets = [0, 0], sizes = [2, 64], strides = [1, 1]} : vector<2x128xf32> to vector<2x64xf32>
    %271 = arith.mulf %270, %261 : vector<2x64xf32>
    %272 = arith.addf %269, %271 : vector<2x64xf32>
    %273 = math.tanh %272 : vector<2x64xf32>
    %274 = arith.mulf %267, %273 : vector<2x64xf32>
    %275 = arith.truncf %274 : vector<2x64xf32> to vector<2x64xbf16>
    %cst_46 = arith.constant dense<0.000000e+00> : vector<2x256xf32>
    %276 = tpu.matmul %275, %3, %cst_46 {dimension_numbers = #tpu.dot_dimension_numbers<[1], [0], [0], [1], [0, 0, 1, 1], [], []>} : vector<2x64xbf16>, vector<64x256xbf16>, vector<2x256xf32> -> vector<2x256xf32>
    %277 = vector.extract_strided_slice %12 {offsets = [0, 5, 0], sizes = [2, 1, 256], strides = [1, 1, 1]} : vector<2x8x256xf32> to vector<2x1x256xf32>
    %278 = vector.shape_cast %277 : vector<2x1x256xf32> to vector<2x256xf32>
    %cst_47 = arith.constant dense<0.000000e+00> : vector<2x256xf32>
    %279 = tpu.matmul %249, %1, %cst_47 {dimension_numbers = #tpu.dot_dimension_numbers<[1], [0], [0], [1], [0, 0, 1, 1], [], []>} : vector<2x64xbf16>, vector<64x256xbf16>, vector<2x256xf32> -> vector<2x256xf32>
    %280 = arith.addf %278, %279 : vector<2x256xf32>
    %281 = vector.extract_strided_slice %280 {offsets = [0, 0], sizes = [2, 128], strides = [1, 1]} : vector<2x256xf32> to vector<2x128xf32>
    %282 = arith.negf %281 : vector<2x128xf32>
    %283 = math.exp %282 : vector<2x128xf32>
    %cst_48 = arith.constant 1.000000e+00 : f32
    %284 = vector.broadcast %cst_48 : f32 to vector<2x128xf32>
    %285 = arith.addf %284, %283 : vector<2x128xf32>
    %286 = arith.divf %284, %285 : vector<2x128xf32>
    %287 = vector.extract_strided_slice %280 {offsets = [0, 128], sizes = [2, 64], strides = [1, 1]} : vector<2x256xf32> to vector<2x64xf32>
    %288 = math.tanh %287 : vector<2x64xf32>
    %289 = vector.extract_strided_slice %280 {offsets = [0, 192], sizes = [2, 64], strides = [1, 1]} : vector<2x256xf32> to vector<2x64xf32>
    %290 = arith.negf %289 : vector<2x64xf32>
    %291 = math.exp %290 : vector<2x64xf32>
    %cst_49 = arith.constant 1.000000e+00 : f32
    %292 = vector.broadcast %cst_49 : f32 to vector<2x64xf32>
    %293 = arith.addf %292, %291 : vector<2x64xf32>
    %294 = arith.divf %292, %293 : vector<2x64xf32>
    %295 = vector.extract_strided_slice %286 {offsets = [0, 64], sizes = [2, 64], strides = [1, 1]} : vector<2x128xf32> to vector<2x64xf32>
    %296 = arith.mulf %295, %246 : vector<2x64xf32>
    %297 = vector.extract_strided_slice %286 {offsets = [0, 0], sizes = [2, 64], strides = [1, 1]} : vector<2x128xf32> to vector<2x64xf32>
    %298 = arith.mulf %297, %288 : vector<2x64xf32>
    %299 = arith.addf %296, %298 : vector<2x64xf32>
    %300 = math.tanh %299 : vector<2x64xf32>
    %301 = arith.mulf %294, %300 : vector<2x64xf32>
    %302 = arith.truncf %301 : vector<2x64xf32> to vector<2x64xbf16>
    %cst_50 = arith.constant dense<0.000000e+00> : vector<2x256xf32>
    %303 = tpu.matmul %302, %2, %cst_50 {dimension_numbers = #tpu.dot_dimension_numbers<[1], [0], [0], [1], [0, 0, 1, 1], [], []>} : vector<2x64xbf16>, vector<64x256xbf16>, vector<2x256xf32> -> vector<2x256xf32>
    %304 = vector.broadcast %5 : vector<1x256xf32> to vector<2x256xf32>
    %305 = arith.addf %303, %304 : vector<2x256xf32>
    %306 = arith.addf %305, %276 : vector<2x256xf32>
    %307 = vector.extract_strided_slice %306 {offsets = [0, 0], sizes = [2, 128], strides = [1, 1]} : vector<2x256xf32> to vector<2x128xf32>
    %308 = arith.negf %307 : vector<2x128xf32>
    %309 = math.exp %308 : vector<2x128xf32>
    %cst_51 = arith.constant 1.000000e+00 : f32
    %310 = vector.broadcast %cst_51 : f32 to vector<2x128xf32>
    %311 = arith.addf %310, %309 : vector<2x128xf32>
    %312 = arith.divf %310, %311 : vector<2x128xf32>
    %313 = vector.extract_strided_slice %306 {offsets = [0, 128], sizes = [2, 64], strides = [1, 1]} : vector<2x256xf32> to vector<2x64xf32>
    %314 = math.tanh %313 : vector<2x64xf32>
    %315 = vector.extract_strided_slice %306 {offsets = [0, 192], sizes = [2, 64], strides = [1, 1]} : vector<2x256xf32> to vector<2x64xf32>
    %316 = arith.negf %315 : vector<2x64xf32>
    %317 = math.exp %316 : vector<2x64xf32>
    %cst_52 = arith.constant 1.000000e+00 : f32
    %318 = vector.broadcast %cst_52 : f32 to vector<2x64xf32>
    %319 = arith.addf %318, %317 : vector<2x64xf32>
    %320 = arith.divf %318, %319 : vector<2x64xf32>
    %321 = vector.extract_strided_slice %312 {offsets = [0, 64], sizes = [2, 64], strides = [1, 1]} : vector<2x128xf32> to vector<2x64xf32>
    %322 = arith.mulf %321, %272 : vector<2x64xf32>
    %323 = vector.extract_strided_slice %312 {offsets = [0, 0], sizes = [2, 64], strides = [1, 1]} : vector<2x128xf32> to vector<2x64xf32>
    %324 = arith.mulf %323, %314 : vector<2x64xf32>
    %325 = arith.addf %322, %324 : vector<2x64xf32>
    %326 = math.tanh %325 : vector<2x64xf32>
    %327 = arith.mulf %320, %326 : vector<2x64xf32>
    %328 = arith.truncf %327 : vector<2x64xf32> to vector<2x64xbf16>
    %cst_53 = arith.constant dense<0.000000e+00> : vector<2x256xf32>
    %329 = tpu.matmul %328, %3, %cst_53 {dimension_numbers = #tpu.dot_dimension_numbers<[1], [0], [0], [1], [0, 0, 1, 1], [], []>} : vector<2x64xbf16>, vector<64x256xbf16>, vector<2x256xf32> -> vector<2x256xf32>
    %330 = vector.extract_strided_slice %12 {offsets = [0, 6, 0], sizes = [2, 1, 256], strides = [1, 1, 1]} : vector<2x8x256xf32> to vector<2x1x256xf32>
    %331 = vector.shape_cast %330 : vector<2x1x256xf32> to vector<2x256xf32>
    %cst_54 = arith.constant dense<0.000000e+00> : vector<2x256xf32>
    %332 = tpu.matmul %302, %1, %cst_54 {dimension_numbers = #tpu.dot_dimension_numbers<[1], [0], [0], [1], [0, 0, 1, 1], [], []>} : vector<2x64xbf16>, vector<64x256xbf16>, vector<2x256xf32> -> vector<2x256xf32>
    %333 = arith.addf %331, %332 : vector<2x256xf32>
    %334 = vector.extract_strided_slice %333 {offsets = [0, 0], sizes = [2, 128], strides = [1, 1]} : vector<2x256xf32> to vector<2x128xf32>
    %335 = arith.negf %334 : vector<2x128xf32>
    %336 = math.exp %335 : vector<2x128xf32>
    %cst_55 = arith.constant 1.000000e+00 : f32
    %337 = vector.broadcast %cst_55 : f32 to vector<2x128xf32>
    %338 = arith.addf %337, %336 : vector<2x128xf32>
    %339 = arith.divf %337, %338 : vector<2x128xf32>
    %340 = vector.extract_strided_slice %333 {offsets = [0, 128], sizes = [2, 64], strides = [1, 1]} : vector<2x256xf32> to vector<2x64xf32>
    %341 = math.tanh %340 : vector<2x64xf32>
    %342 = vector.extract_strided_slice %333 {offsets = [0, 192], sizes = [2, 64], strides = [1, 1]} : vector<2x256xf32> to vector<2x64xf32>
    %343 = arith.negf %342 : vector<2x64xf32>
    %344 = math.exp %343 : vector<2x64xf32>
    %cst_56 = arith.constant 1.000000e+00 : f32
    %345 = vector.broadcast %cst_56 : f32 to vector<2x64xf32>
    %346 = arith.addf %345, %344 : vector<2x64xf32>
    %347 = arith.divf %345, %346 : vector<2x64xf32>
    %348 = vector.extract_strided_slice %339 {offsets = [0, 64], sizes = [2, 64], strides = [1, 1]} : vector<2x128xf32> to vector<2x64xf32>
    %349 = arith.mulf %348, %299 : vector<2x64xf32>
    %350 = vector.extract_strided_slice %339 {offsets = [0, 0], sizes = [2, 64], strides = [1, 1]} : vector<2x128xf32> to vector<2x64xf32>
    %351 = arith.mulf %350, %341 : vector<2x64xf32>
    %352 = arith.addf %349, %351 : vector<2x64xf32>
    %353 = math.tanh %352 : vector<2x64xf32>
    %354 = arith.mulf %347, %353 : vector<2x64xf32>
    %355 = arith.truncf %354 : vector<2x64xf32> to vector<2x64xbf16>
    %cst_57 = arith.constant dense<0.000000e+00> : vector<2x256xf32>
    %356 = tpu.matmul %355, %2, %cst_57 {dimension_numbers = #tpu.dot_dimension_numbers<[1], [0], [0], [1], [0, 0, 1, 1], [], []>} : vector<2x64xbf16>, vector<64x256xbf16>, vector<2x256xf32> -> vector<2x256xf32>
    %357 = vector.broadcast %5 : vector<1x256xf32> to vector<2x256xf32>
    %358 = arith.addf %356, %357 : vector<2x256xf32>
    %359 = arith.addf %358, %329 : vector<2x256xf32>
    %360 = vector.extract_strided_slice %359 {offsets = [0, 0], sizes = [2, 128], strides = [1, 1]} : vector<2x256xf32> to vector<2x128xf32>
    %361 = arith.negf %360 : vector<2x128xf32>
    %362 = math.exp %361 : vector<2x128xf32>
    %cst_58 = arith.constant 1.000000e+00 : f32
    %363 = vector.broadcast %cst_58 : f32 to vector<2x128xf32>
    %364 = arith.addf %363, %362 : vector<2x128xf32>
    %365 = arith.divf %363, %364 : vector<2x128xf32>
    %366 = vector.extract_strided_slice %359 {offsets = [0, 128], sizes = [2, 64], strides = [1, 1]} : vector<2x256xf32> to vector<2x64xf32>
    %367 = math.tanh %366 : vector<2x64xf32>
    %368 = vector.extract_strided_slice %359 {offsets = [0, 192], sizes = [2, 64], strides = [1, 1]} : vector<2x256xf32> to vector<2x64xf32>
    %369 = arith.negf %368 : vector<2x64xf32>
    %370 = math.exp %369 : vector<2x64xf32>
    %cst_59 = arith.constant 1.000000e+00 : f32
    %371 = vector.broadcast %cst_59 : f32 to vector<2x64xf32>
    %372 = arith.addf %371, %370 : vector<2x64xf32>
    %373 = arith.divf %371, %372 : vector<2x64xf32>
    %374 = vector.extract_strided_slice %365 {offsets = [0, 64], sizes = [2, 64], strides = [1, 1]} : vector<2x128xf32> to vector<2x64xf32>
    %375 = arith.mulf %374, %325 : vector<2x64xf32>
    %376 = vector.extract_strided_slice %365 {offsets = [0, 0], sizes = [2, 64], strides = [1, 1]} : vector<2x128xf32> to vector<2x64xf32>
    %377 = arith.mulf %376, %367 : vector<2x64xf32>
    %378 = arith.addf %375, %377 : vector<2x64xf32>
    %379 = math.tanh %378 : vector<2x64xf32>
    %380 = arith.mulf %373, %379 : vector<2x64xf32>
    %381 = arith.truncf %380 : vector<2x64xf32> to vector<2x64xbf16>
    %cst_60 = arith.constant dense<0.000000e+00> : vector<2x256xf32>
    %382 = tpu.matmul %381, %3, %cst_60 {dimension_numbers = #tpu.dot_dimension_numbers<[1], [0], [0], [1], [0, 0, 1, 1], [], []>} : vector<2x64xbf16>, vector<64x256xbf16>, vector<2x256xf32> -> vector<2x256xf32>
    %383 = vector.extract_strided_slice %12 {offsets = [0, 7, 0], sizes = [2, 1, 256], strides = [1, 1, 1]} : vector<2x8x256xf32> to vector<2x1x256xf32>
    %384 = vector.shape_cast %383 : vector<2x1x256xf32> to vector<2x256xf32>
    %cst_61 = arith.constant dense<0.000000e+00> : vector<2x256xf32>
    %385 = tpu.matmul %355, %1, %cst_61 {dimension_numbers = #tpu.dot_dimension_numbers<[1], [0], [0], [1], [0, 0, 1, 1], [], []>} : vector<2x64xbf16>, vector<64x256xbf16>, vector<2x256xf32> -> vector<2x256xf32>
    %386 = arith.addf %384, %385 : vector<2x256xf32>
    %387 = vector.extract_strided_slice %386 {offsets = [0, 0], sizes = [2, 128], strides = [1, 1]} : vector<2x256xf32> to vector<2x128xf32>
    %388 = arith.negf %387 : vector<2x128xf32>
    %389 = math.exp %388 : vector<2x128xf32>
    %cst_62 = arith.constant 1.000000e+00 : f32
    %390 = vector.broadcast %cst_62 : f32 to vector<2x128xf32>
    %391 = arith.addf %390, %389 : vector<2x128xf32>
    %392 = arith.divf %390, %391 : vector<2x128xf32>
    %393 = vector.extract_strided_slice %386 {offsets = [0, 128], sizes = [2, 64], strides = [1, 1]} : vector<2x256xf32> to vector<2x64xf32>
    %394 = math.tanh %393 : vector<2x64xf32>
    %395 = vector.extract_strided_slice %386 {offsets = [0, 192], sizes = [2, 64], strides = [1, 1]} : vector<2x256xf32> to vector<2x64xf32>
    %396 = arith.negf %395 : vector<2x64xf32>
    %397 = math.exp %396 : vector<2x64xf32>
    %cst_63 = arith.constant 1.000000e+00 : f32
    %398 = vector.broadcast %cst_63 : f32 to vector<2x64xf32>
    %399 = arith.addf %398, %397 : vector<2x64xf32>
    %400 = arith.divf %398, %399 : vector<2x64xf32>
    %401 = vector.extract_strided_slice %392 {offsets = [0, 64], sizes = [2, 64], strides = [1, 1]} : vector<2x128xf32> to vector<2x64xf32>
    %402 = arith.mulf %401, %352 : vector<2x64xf32>
    %403 = vector.extract_strided_slice %392 {offsets = [0, 0], sizes = [2, 64], strides = [1, 1]} : vector<2x128xf32> to vector<2x64xf32>
    %404 = arith.mulf %403, %394 : vector<2x64xf32>
    %405 = arith.addf %402, %404 : vector<2x64xf32>
    %406 = math.tanh %405 : vector<2x64xf32>
    %407 = arith.mulf %400, %406 : vector<2x64xf32>
    %408 = arith.truncf %407 : vector<2x64xf32> to vector<2x64xbf16>
    %cst_64 = arith.constant dense<0.000000e+00> : vector<2x256xf32>
    %409 = tpu.matmul %408, %2, %cst_64 {dimension_numbers = #tpu.dot_dimension_numbers<[1], [0], [0], [1], [0, 0, 1, 1], [], []>} : vector<2x64xbf16>, vector<64x256xbf16>, vector<2x256xf32> -> vector<2x256xf32>
    %410 = vector.broadcast %5 : vector<1x256xf32> to vector<2x256xf32>
    %411 = arith.addf %409, %410 : vector<2x256xf32>
    %412 = arith.addf %411, %382 : vector<2x256xf32>
    %413 = vector.extract_strided_slice %412 {offsets = [0, 0], sizes = [2, 128], strides = [1, 1]} : vector<2x256xf32> to vector<2x128xf32>
    %414 = arith.negf %413 : vector<2x128xf32>
    %415 = math.exp %414 : vector<2x128xf32>
    %cst_65 = arith.constant 1.000000e+00 : f32
    %416 = vector.broadcast %cst_65 : f32 to vector<2x128xf32>
    %417 = arith.addf %416, %415 : vector<2x128xf32>
    %418 = arith.divf %416, %417 : vector<2x128xf32>
    %419 = vector.extract_strided_slice %412 {offsets = [0, 128], sizes = [2, 64], strides = [1, 1]} : vector<2x256xf32> to vector<2x64xf32>
    %420 = math.tanh %419 : vector<2x64xf32>
    %421 = vector.extract_strided_slice %412 {offsets = [0, 192], sizes = [2, 64], strides = [1, 1]} : vector<2x256xf32> to vector<2x64xf32>
    %422 = arith.negf %421 : vector<2x64xf32>
    %423 = math.exp %422 : vector<2x64xf32>
    %cst_66 = arith.constant 1.000000e+00 : f32
    %424 = vector.broadcast %cst_66 : f32 to vector<2x64xf32>
    %425 = arith.addf %424, %423 : vector<2x64xf32>
    %426 = arith.divf %424, %425 : vector<2x64xf32>
    %427 = vector.extract_strided_slice %418 {offsets = [0, 64], sizes = [2, 64], strides = [1, 1]} : vector<2x128xf32> to vector<2x64xf32>
    %428 = arith.mulf %427, %378 : vector<2x64xf32>
    %429 = vector.extract_strided_slice %418 {offsets = [0, 0], sizes = [2, 64], strides = [1, 1]} : vector<2x128xf32> to vector<2x64xf32>
    %430 = arith.mulf %429, %420 : vector<2x64xf32>
    %431 = arith.addf %428, %430 : vector<2x64xf32>
    %432 = math.tanh %431 : vector<2x64xf32>
    %433 = arith.mulf %426, %432 : vector<2x64xf32>
    %c0_67 = arith.constant 0 : index
    %c1024 = arith.constant 1024 : index
    %434 = vector.load %arg2[%c0_67, %c1024] : memref<128x1792xbf16, #tpu.memory_space<vmem>>, vector<11x32xbf16>
    %c0_68 = arith.constant 0 : index
    %c1152 = arith.constant 1152 : index
    %435 = vector.load %arg2[%c0_68, %c1152] : memref<128x1792xbf16, #tpu.memory_space<vmem>>, vector<32x32xbf16>
    %c0_69 = arith.constant 0 : index
    %c512_70 = arith.constant 512 : index
    %436 = vector.load %arg3[%c0_69, %c512_70] : memref<1x1280xf32, #tpu.memory_space<vmem>>, vector<1x32xf32>
    %c0_71 = arith.constant 0 : index
    %c640 = arith.constant 640 : index
    %437 = vector.load %arg3[%c0_71, %c640] : memref<1x1280xf32, #tpu.memory_space<vmem>>, vector<1x32xf32>
    %c0_72 = arith.constant 0 : index
    %c0_73 = arith.constant 0 : index
    %438 = vector.load %arg1[%c0_72, %c0_73] : memref<2x11xf32, #tpu.memory_space<vmem>>, vector<2x11xf32>
    %439 = arith.truncf %438 : vector<2x11xf32> to vector<2x11xbf16>
    %cst_74 = arith.constant dense<0.000000e+00> : vector<2x32xf32>
    %440 = tpu.matmul %439, %434, %cst_74 {dimension_numbers = #tpu.dot_dimension_numbers<[1], [0], [0], [1], [0, 0, 1, 1], [], []>} : vector<2x11xbf16>, vector<11x32xbf16>, vector<2x32xf32> -> vector<2x32xf32>
    %441 = vector.broadcast %436 : vector<1x32xf32> to vector<2x32xf32>
    %442 = arith.addf %440, %441 : vector<2x32xf32>
    %cst_75 = arith.constant 0.000000e+00 : f32
    %443 = vector.broadcast %cst_75 : f32 to vector<2x32xf32>
    %444 = arith.maximumf %442, %443 : vector<2x32xf32>
    %445 = arith.truncf %444 : vector<2x32xf32> to vector<2x32xbf16>
    %cst_76 = arith.constant dense<0.000000e+00> : vector<2x32xf32>
    %446 = tpu.matmul %445, %435, %cst_76 {dimension_numbers = #tpu.dot_dimension_numbers<[1], [0], [0], [1], [0, 0, 1, 1], [], []>} : vector<2x32xbf16>, vector<32x32xbf16>, vector<2x32xf32> -> vector<2x32xf32>
    %447 = vector.broadcast %437 : vector<1x32xf32> to vector<2x32xf32>
    %448 = arith.addf %446, %447 : vector<2x32xf32>
    %cst_77 = arith.constant 0.000000e+00 : f32
    %449 = vector.broadcast %cst_77 : f32 to vector<2x32xf32>
    %450 = arith.maximumf %448, %449 : vector<2x32xf32>
    %451 = tpu.concatenate %433, %450 in 1 : vector<2x64xf32>, vector<2x32xf32> -> vector<2x96xf32>
    %452 = arith.truncf %451 : vector<2x96xf32> to vector<2x96xbf16>
    %c0_78 = arith.constant 0 : index
    %c1280 = arith.constant 1280 : index
    %453 = vector.load %arg2[%c0_78, %c1280] : memref<128x1792xbf16, #tpu.memory_space<vmem>>, vector<96x160xbf16>
    %c0_79 = arith.constant 0 : index
    %c768_80 = arith.constant 768 : index
    %454 = vector.load %arg3[%c0_79, %c768_80] : memref<1x1280xf32, #tpu.memory_space<vmem>>, vector<1x160xf32>
    %cst_81 = arith.constant dense<0.000000e+00> : vector<2x160xf32>
    %455 = tpu.matmul %452, %453, %cst_81 {dimension_numbers = #tpu.dot_dimension_numbers<[1], [0], [0], [1], [0, 0, 1, 1], [], []>} : vector<2x96xbf16>, vector<96x160xbf16>, vector<2x160xf32> -> vector<2x160xf32>
    %456 = vector.broadcast %454 : vector<1x160xf32> to vector<2x160xf32>
    %457 = arith.addf %455, %456 : vector<2x160xf32>
    %cst_82 = arith.constant 0.000000e+00 : f32
    %458 = vector.broadcast %cst_82 : f32 to vector<2x160xf32>
    %459 = arith.maximumf %457, %458 : vector<2x160xf32>
    %460 = vector.extract_strided_slice %459 {offsets = [0, 0], sizes = [2, 64], strides = [1, 1]} : vector<2x160xf32> to vector<2x64xf32>
    %461 = vector.extract_strided_slice %459 {offsets = [0, 64], sizes = [2, 64], strides = [1, 1]} : vector<2x160xf32> to vector<2x64xf32>
    %462 = vector.extract_strided_slice %459 {offsets = [0, 128], sizes = [2, 32], strides = [1, 1]} : vector<2x160xf32> to vector<2x32xf32>
    %c0_83 = arith.constant 0 : index
    %c1536 = arith.constant 1536 : index
    %463 = vector.load %arg2[%c0_83, %c1536] : memref<128x1792xbf16, #tpu.memory_space<vmem>>, vector<64x32xbf16>
    %c0_84 = arith.constant 0 : index
    %c1024_85 = arith.constant 1024 : index
    %464 = vector.load %arg3[%c0_84, %c1024_85] : memref<1x1280xf32, #tpu.memory_space<vmem>>, vector<1x32xf32>
    %465 = arith.truncf %461 : vector<2x64xf32> to vector<2x64xbf16>
    %cst_86 = arith.constant dense<0.000000e+00> : vector<2x32xf32>
    %466 = tpu.matmul %465, %463, %cst_86 {dimension_numbers = #tpu.dot_dimension_numbers<[1], [0], [0], [1], [0, 0, 1, 1], [], []>} : vector<2x64xbf16>, vector<64x32xbf16>, vector<2x32xf32> -> vector<2x32xf32>
    %467 = vector.broadcast %464 : vector<1x32xf32> to vector<2x32xf32>
    %468 = arith.addf %466, %467 : vector<2x32xf32>
    %cst_87 = arith.constant 0.000000e+00 : f32
    %469 = vector.broadcast %cst_87 : f32 to vector<2x32xf32>
    %470 = arith.maximumf %468, %469 : vector<2x32xf32>
    %c0_88 = arith.constant 0 : index
    %c1664 = arith.constant 1664 : index
    %471 = vector.load %arg2[%c0_88, %c1664] : memref<128x1792xbf16, #tpu.memory_space<vmem>>, vector<128x128xbf16>
    %c0_89 = arith.constant 0 : index
    %c1152_90 = arith.constant 1152 : index
    %472 = vector.load %arg3[%c0_89, %c1152_90] : memref<1x1280xf32, #tpu.memory_space<vmem>>, vector<1x128xf32>
    %473 = tpu.concatenate %460, %470, %462 in 1 : vector<2x64xf32>, vector<2x32xf32>, vector<2x32xf32> -> vector<2x128xf32>
    %474 = arith.truncf %473 : vector<2x128xf32> to vector<2x128xbf16>
    %cst_91 = arith.constant dense<0.000000e+00> : vector<2x128xf32>
    %475 = tpu.matmul %474, %471, %cst_91 {dimension_numbers = #tpu.dot_dimension_numbers<[1], [0], [0], [1], [0, 0, 1, 1], [], []>} : vector<2x128xbf16>, vector<128x128xbf16>, vector<2x128xf32> -> vector<2x128xf32>
    %476 = vector.broadcast %472 : vector<1x128xf32> to vector<2x128xf32>
    %477 = arith.addf %475, %476 : vector<2x128xf32>
    %c0_92 = arith.constant 0 : index
    %c0_93 = arith.constant 0 : index
    %478 = vector.load %arg4[%c0_92, %c0_93] : memref<2x128xf32, #tpu.memory_space<vmem>>, vector<2x128xf32>
    tpu.vector_store %arg4[%c0_92, %c0_93], %477 {strides = array<i32>} : memref<2x128xf32, #tpu.memory_space<vmem>>, vector<2x128xf32>,
    return
  }
}

</mosaic_0001>

<bundles_post_ra>
// kernel: tpu_custom_call.1
= control target key start
LH: loop header
LB: loop body
LE: loop exit
PB: predicated region body
PF: predicated region fallthrough
CT: control target
= control target key end

     0   :  { %9 = vsyncpa [#allocation3], 0  ;;  %s3853_s0 = inlined_call_operand.vmem [shape: f32[2,8,2], index: 0, kind: input, shape index: {}]   ;;  %s3854_s1 = inlined_call_operand.vmem [shape: f32[2,11], index: 1, kind: input, shape index: {}]   ;;  %s3855_s2 = inlined_call_operand.hbm [shape: bf16[128,1792], index: 2, kind: input, shape index: {}]   ;;  %s3856_s3 = inlined_call_operand.vmem [shape: f32[1,1280], index: 3, kind: input, shape index: {}]   ;;  %s3857_s4 = inlined_call_operand.hbm [shape: f32[2,128], index: 4, kind: output, shape index: {}]  }
   0x1   :  { %10 = vsyncpa [#allocation4], 0  ;;  %s3202_s15 = smov [#allocation2]   ;;  %s3154_s19 = scalar_lea.hbm %s3855_s2, 14336 }
   0x2   :  { %s20_s16 = sshll.u32 %s3202_s15, 4  ;;  %p3155_p0 = scmp.ne.s32.totalorder %s3855_s2, %s3154_s19  ;;  %s21_s16 = int_to_ptr.vmem [resolvable:$true] %s20_s16 }
   0x3   :  { %p3158_p1 = scmp.lt.u32.totalorder %s3154_s19, %s3855_s2 }
   0x5   :  { %p3160_p2 = pnand %p3158_p1, %p3155_p0 }
   0x7   :  { %3163 = shalt.err (!%p3160_p2)
}
   0x8   :  { %s3164_s24 = scalar_lea.vmem %s21_s16, 14336  ;;  %p3169_p4 = scmp.lt.s32.totalorder %s21_s16, %s21_s16 }
   0x9   :  { %p3165_p3 = scmp.ne.s32.totalorder %s21_s16, %s3164_s24  ;;  %p3170_p5 = scmp.lt.s32.totalorder %s3164_s24, %s3164_s24 }
   0xb   :  { %p3171_p6 = por %p3170_p5, %p3169_p4 }
   0xd   :  { %p3172_p7 = pnand %p3171_p6, %p3165_p3 }
   0xf   :  { %3175 = shalt.err (!%p3172_p7)
}
  0x10   :  { %s3203_s25 = smov 896   ;;  %s3204_s26 = smov 56  }
  0x11   :  { %26 = dma.hbm_to_vmem [thread:$0]  %s3855_s2, 14336, %s21_s16, [#allocation3], %s3203_s25, %s3203_s25, %s3204_s26  }
  0x12   :  { %3198 = dma.done.wait [#allocation3], 14336  }
  0x13   :  { %3199 = vsyncadd [#allocation3], 4294952960  ;;  %v3205_v0 = vmov 0   ;;  %v33_v1 = vld [vmem:[#allocation2] sm:$0x11]  ;;  %vm83_vm0 = vcmask 1040384   ;;  %v64_v8 = vlaneseq }
  0x14   :  { %122 = vmatprep.mubr.bf16.mxu0 %v3205_v0  ;;  %276 = vmatprep.mubr.bf16.mxu1 %v3205_v0  ;;  %v60_v2 = vld [vmem:[%s3853_s0] sm:$0xff]  ;;  %v61_v3 = vld [vmem:[%s3853_s0 + $0x8] sm:$0xff]  ;;  %v2519_v4 = vcombine.high %v33_v1, %v33_v1  ;;  %v2518_v5 = vcombine.low %v33_v1, %v33_v1  ;;  %vm79_vm1 = vcmask 15360   ;;  %s3206_s0 = smov 64   ;;  %vm195_vm2 = vcmask 1041409   ;;  %s3210_s17 = smov 96  }
  0x15   :  { %v62_v7 = vpack.c.bf16 %v61_v3, %v60_v2  ;;  %v65_v9 = vshrl.u32 %v64_v8, 7  ;;  %v58_v11 = vld [vmem:[%s3856_s3] sm:$0x3]  ;;  %v3281_v35 = vld [vmem:[#allocation2 + $0x14] ss:$56 sps:$4 sm:$0xff]   ;;  %vm240_vm3 = vcmask 523264  }
  0x16   :  { %2520 = vmatprep.subr.msk.bf16.mxu0 %vm83_vm0, %v2519_v4  ;;  %v85_v6 = vsel %vm83_vm0, %v2518_v5, 0  ;;  %v3283_v36 = vld [vmem:[#allocation2 + $0x10] ss:$56 sps:$4 sm:$0xff]   ;;  %v3285_v37 = vld [vmem:[#allocation2 + $0x84] ss:$56 sps:$4 sm:$0xff]   ;;  %244 = vmatprep.subr.bf16.mxu1 %v3281_v35  ;;  %vm2040_vm4 = vcmask 1044480  }
  0x17   :  { %91 = vmatpush1.bf16.msra.mxu0 %v85_v6  ;;  %v3258_v10 = vsub.s32 0, %v65_v9  ;;  %v3270_v21 = vsub.s32 1, %v65_v9  ;;  %245 = vmatpush1.bf16.msra.mxu1 %v3283_v36  ;;  %v3290_v38 = vld [vmem:[#allocation2 + $0x80] ss:$56 sps:$4 sm:$0xff]   ;;  %v3294_v39 = vld [vmem:[#allocation2 + $0xf4] ss:$56 sps:$4 sm:$0xff]  }
  0x18   :  { %552 = vmatprep.subr.bf16.mxu0 %v3281_v35  ;;  %246 = vmatprep.subr.bf16.mxu1 %v3285_v37  ;;  %v3298_v40 = vld [vmem:[#allocation2 + $0xf0] ss:$56 sps:$4 sm:$0xff]   ;;  %v3302_v41 = vld [vmem:[#allocation2 + $0x164] ss:$56 sps:$4 sm:$0xff]   ;;  %v3306_v42 = vld [vmem:[#allocation2 + $0x160] ss:$56 sps:$4 sm:$0xff]  }
  0x19   :  { %v67_v12 = vrot.slane %v58_v11, %v3258_v10  ;;  %v71_v22 = vrot.slane %v58_v11, %v3270_v21  ;;  %v59_v6 = vld [vmem:[%s3856_s3 + $0x2] sm:$0x3]  ;;  %vm2041_vm5 = vcmask 1045504   ;;  %vm3209_vm6 = vmmov 0   ;;  %s3211_s22 = smov [#allocation5]  }
  0x1a   :  { %2521 = vmatmul.mubr.msk.bf16.vlgmr.msra.gmra.mrb[0].mxu0 %vm79_vm1, %v62_v7  ;;  %v3332_v7 = vrot.slane %v59_v6, %v3258_v10  ;;  %vm2036_vm7 = vcmask 89088   ;;  %vm2107_vm8 = vcmask 261120   ;;  %vm2246_vm9 = vcmask 785408   ;;  %s2509_s23 = sshll.u32 %s3211_s22, 4  ;;  %s2510_s23 = int_to_ptr.vmem [resolvable:$true] %s2509_s23 }
  0x1b   :  { %584 = vmatprep.mubr.bf16.mxu0 %v3205_v0  ;;  %553 = vmatpush1.bf16.msra.mxu0 %v3283_v36  ;;  %s3176_s24 = scalar_lea.vmem %s2510_s23, 32  ;;  %p3181_p9 = scmp.lt.s32.totalorder %s2510_s23, %s2510_s23 }
  0x1c   :  { %554 = vmatprep.subr.bf16.mxu0 %v3285_v37  ;;  %247 = vmatpush1.bf16.msra.mxu1 %v3290_v38  ;;  %p3177_p8 = scmp.ne.s32.totalorder %s2510_s23, %s3176_s24  ;;  %p3182_p10 = scmp.lt.s32.totalorder %s3176_s24, %s3176_s24 }
  0x1d   :  { %248 = vmatprep.subr.bf16.mxu1 %v3294_v39 }
  0x1e   :  { %p3183_p11 = por %p3182_p10, %p3181_p9 }
  0x1f   :  { %555 = vmatpush1.bf16.msra.mxu0 %v3290_v38 }
  0x20   :  { %556 = vmatprep.subr.bf16.mxu0 %v3294_v39  ;;  %249 = vmatpush1.bf16.msra.mxu1 %v3298_v40  ;;  %p3184_p12 = pnand %p3183_p11, %p3177_p8 }
  0x21   :  { %250 = vmatprep.subr.bf16.mxu1 %v3302_v41 }
  0x23   :  { %557 = vmatpush1.bf16.msra.mxu0 %v3298_v40 }
  0x24   :  { %558 = vmatprep.subr.bf16.mxu0 %v3302_v41  ;;  %251 = vmatpush1.bf16.msra.mxu1 %v3306_v42 }
  0x27   :  { %559 = vmatpush1.bf16.msra.mxu0 %v3306_v42 }
  0xed   :  { %v124_v13 = vpop.f32.mrb[0].mxu0 }
  0xee   :  { %v3264_v14 = vadd.f32 %v124_v13, %v67_v12  ;;  %v126_v15 = vpop.f32.mrb[1].mxu0 }
  0xef   :  { %v128_v16 = vpop.f32.mrb[2].mxu0  ;;  %v3276_v28 = vadd.f32 %v126_v15, %v71_v22 }
  0xf0   :  { %v3266_v17 = vadd.f32 %v128_v16, %v67_v12  ;;  %v130_v18 = vpop.f32.mrb[3].mxu0  ;;  %v2522_v19 = vmul.f32 -1.442695, %v3264_v14  ;;  %v3336_v16 = vrot.slane %v59_v6, %v3270_v21 }
  0xf1   :  { %v3273_v24 = vadd.f32 %v130_v18, %v71_v22  ;;  %v2524_v44 = vmul.f32 -1.442695, %v3276_v28 }
  0xf2   :  { %v2523_v20 = vmul.f32 -1.442695, %v3266_v17  ;;  %2842 = vpow2.f32 %v2522_v19 }
  0xf3   :  { %v2525_v43 = vmul.f32 -1.442695, %v3273_v24 }
  0xf4   :  { %2844 = vpow2.f32 %v2523_v20 }
  0xf5   :  { %2846 = vtanh.f32 %v3273_v24 }
  0xfc   :  { %v2843_v23 = vpop.eup %2842 }
  0xfd   :  { %v139_v27 = vadd.f32 1.0, %v2843_v23 }
  0xfe   :  { %v2845_v25 = vpop.eup %2844 }
  0xff   :  { %v140_v26 = vadd.f32 1.0, %v2845_v25  ;;  %v2847_v29 = vpop.eup %2846 }
 0x101   :  { %2848 = vrcp.f32 %v140_v26  ;;  %v3340_v26 = vld [vmem:[#allocation2 + $0x1c] ss:$56 sps:$4 sm:$0xff]  }
 0x102   :  { %2850 = vrcp.f32 %v139_v27  ;;  %v3342_v27 = vld [vmem:[#allocation2 + $0x18] ss:$56 sps:$4 sm:$0xff]   ;;  %354 = vmatprep.subr.bf16.mxu1 %v3340_v26 }
 0x103   :  { %2852 = vtanh.f32 %v3276_v28 }
 0x104   :  { %2854 = vpow2.f32 %v2525_v43  ;;  %v3363_v43 = vld [vmem:[#allocation2 + $0x168] ss:$56 sps:$4 sm:$0xff]  }
 0x105   :  { %2856 = vpow2.f32 %v2524_v44 }
 0x10b   :  { %v2849_v30 = vpop.eup %2848 }
 0x10c   :  { %v162_v31 = vmul.f32 %v2849_v30, %v2847_v29  ;;  %v2851_v32 = vpop.eup %2850  ;;  %v160_v48 = vmul.f32 0.0, %v2849_v30  ;;  %v3344_v29 = vld [vmem:[#allocation2 + $0x8c] ss:$56 sps:$4 sm:$0xff]  }
 0x10d   :  { %v2853_v33 = vpop.eup %2852  ;;  %v159_v52 = vmul.f32 0.0, %v2851_v32  ;;  %v3347_v30 = vld [vmem:[#allocation2 + $0xc] ss:$56 sps:$4 sm:$0xff]  }
 0x10e   :  { %167 = vrot.lane.b32.xlu0 %v162_v31, %s3206_s0  ;;  %v161_v34 = vmul.f32 %v2853_v33, %v2851_v32  ;;  %v2855_v45 = vpop.eup %2854  ;;  %v3350_v31 = vld [vmem:[#allocation2 + $0x88] ss:$56 sps:$4 sm:$0xff]   ;;  %v3353_v32 = vld [vmem:[#allocation2 + $0xfc] ss:$56 sps:$4 sm:$0xff]   ;;  %665 = vmatprep.subr.bf16.mxu0 %v3347_v30  ;;  %v3357_v33 = vld [vmem:[#allocation2 + $0xf8] ss:$56 sps:$4 sm:$0xff]  }
 0x10f   :  { %v154_v46 = vadd.f32 1.0, %v2855_v45  ;;  %v2857_v47 = vpop.eup %2856 }
 0x110   :  { %v153_v51 = vadd.f32 1.0, %v2857_v47 }
 0x111   :  { %2858 = vrcp.f32 %v154_v46 }
 0x112   :  { %165 = vrot.lane.b32.xlu0 %v161_v34, %s3206_s0  ;;  %v3360_v34 = vld [vmem:[#allocation2 + $0x16c] ss:$56 sps:$4 sm:$0xff]  }
 0x11b   :  { %v2859_v55 = vpop.eup %2858 }
 0x180   :  { %v168_v49 = vpop.permute.xlu0 %167 }
 0x181   :  { %v3315_v50 = vadd.f32 %v168_v49, %v160_v48 }
 0x183   :  { %2860 = vtanh.f32 %v3315_v50 }
 0x184   :  { %v166_v53 = vpop.permute.xlu0 %165  ;;  %2862 = vrcp.f32 %v153_v51 }
 0x185   :  { %v3318_v54 = vadd.f32 %v166_v53, %v159_v52 }
 0x187   :  { %2864 = vtanh.f32 %v3318_v54 }
 0x18d   :  { %v2861_v56 = vpop.eup %2860 }
 0x18e   :  { %v176_v57 = vmul.f32 %v2861_v56, %v2859_v55  ;;  %v2863_v58 = vpop.eup %2862  ;;  %v3372_v56 = vld [vmem:[#allocation2 + $0x8] ss:$56 sps:$4 sm:$0xff]  }
 0x190   :  { %v178_v59 = vpack.c.bf16 %v176_v57, %v176_v57  ;;  %v3374_v57 = vld [vmem:[#allocation2 + $0x7c] ss:$56 sps:$4 sm:$0xff]  }
 0x191   :  { %v2865_v60 = vpop.eup %2864 }
 0x192   :  { %v175_v61 = vmul.f32 %v2865_v60, %v2863_v58  ;;  %v193_v62 = vunpack.c.l.b16 %v178_v59  ;;  %v3378_v59 = vld [vmem:[#allocation2 + $0x78] ss:$56 sps:$4 sm:$0xff]   ;;  %v3382_v60 = vld [vmem:[#allocation2 + $0xec] ss:$56 sps:$4 sm:$0xff]  }
 0x194   :  { %v177_v63 = vpack.c.bf16 %v175_v61, %v175_v61  ;;  %v194_v2 = vrot.slane %v193_v62, 7  ;;  %v3385_v61 = vld [vmem:[#allocation2 + $0xe8] ss:$56 sps:$4 sm:$0xff]   ;;  %v3388_v62 = vld [vmem:[#allocation2 + $0x15c] ss:$56 sps:$4 sm:$0xff]  }
 0x196   :  { %v192_v1 = vunpack.c.l.b16 %v177_v63  ;;  %v3391_v63 = vld [vmem:[#allocation2 + $0x158] ss:$56 sps:$4 sm:$0xff]  }
 0x198   :  { %v196_v3 = vsel %vm195_vm2, %v194_v2, %v192_v1 }
 0x199   :  { %v197_v4 = vpack.c.b16 %v196_v3, %v196_v3 }
 0x19b   :  { %198 = vrot.lane.b32.xlu1 %v197_v4, %s3206_s0 }
 0x20d   :  { %v3323_v5 = vpop.permute.xlu1 %198 }
 0x20e   :  { %2534 = vmatmul.mubr.msk.bf16.vlgmr.msra.gmra.mrb[0].mxu1 %vm240_vm3, %v3323_v5 }
 0x20f   :  { %386 = vmatprep.mubr.bf16.mxu1 %v3205_v0  ;;  %355 = vmatpush1.bf16.msra.mxu1 %v3342_v27 }
 0x210   :  { %356 = vmatprep.subr.bf16.mxu1 %v3344_v29 }
 0x213   :  { %357 = vmatpush1.bf16.msra.mxu1 %v3350_v31 }
 0x214   :  { %358 = vmatprep.subr.bf16.mxu1 %v3353_v32 }
 0x217   :  { %359 = vmatpush1.bf16.msra.mxu1 %v3357_v33 }
 0x218   :  { %360 = vmatprep.subr.bf16.mxu1 %v3360_v34 }
 0x21b   :  { %361 = vmatpush1.bf16.msra.mxu1 %v3363_v43 }
 0x21c   :  { %435 = vmatprep.subr.bf16.mxu1 %v3347_v30 }
 0x2e1   :  { %v278_v8 = vpop.f32.mrb[0].mxu1 }
 0x2e2   :  { %v279_v9 = vadd.f32 %v278_v8, %v3332_v7  ;;  %v280_v11 = vpop.f32.mrb[1].mxu1 }
 0x2e3   :  { %v282_v12 = vpop.f32.mrb[2].mxu1  ;;  %v281_v18 = vadd.f32 %v280_v11, %v3336_v16 }
 0x2e4   :  { %v2535_v13 = vmul.f32 -1.442695, %v279_v9  ;;  %v283_v15 = vpop.f32.mrb[3].mxu1 }
 0x2e5   :  { %v2536_v44 = vmul.f32 -1.442695, %v281_v18 }
 0x2e6   :  { %2866 = vpow2.f32 %v2535_v13 }
 0x2e7   :  { %2868 = vtanh.f32 %v281_v18 }
 0x2f0   :  { %v2867_v19 = vpop.eup %2866 }
 0x2f1   :  { %v288_v20 = vadd.f32 1.0, %v2867_v19  ;;  %v2869_v22 = vpop.eup %2868 }
 0x2f3   :  { %2870 = vrcp.f32 %v288_v20 }
 0x2f4   :  { %2872 = vpow2.f32 %v2536_v44 }
 0x2fd   :  { %v2871_v23 = vpop.eup %2870 }
 0x2fe   :  { %v299_v25 = vmul.f32 %v2871_v23, %v2869_v22  ;;  %v2873_v45 = vpop.eup %2872  ;;  %v298_v47 = vmul.f32 0.0, %v2871_v23 }
 0x2ff   :  { %v295_v46 = vadd.f32 1.0, %v2873_v45 }
 0x300   :  { %301 = vrot.lane.b32.xlu1 %v299_v25, %s3206_s0 }
 0x301   :  { %2874 = vrcp.f32 %v295_v46 }
 0x30b   :  { %v2875_v51 = vpop.eup %2874 }
 0x372   :  { %v302_v48 = vpop.permute.xlu1 %301 }
 0x373   :  { %v3368_v49 = vadd.f32 %v302_v48, %v298_v47  ;;  %v517_v47 = vrot.slane %v3315_v50, 7 }
 0x375   :  { %2876 = vtanh.f32 %v3368_v49 }
 0x37f   :  { %v2877_v52 = vpop.eup %2876 }
 0x380   :  { %v306_v53 = vmul.f32 %v2877_v52, %v2875_v51  ;;  %v516_v52 = vrot.slane %v3318_v54, 7 }
 0x382   :  { %v307_v55 = vpack.c.bf16 %v306_v53, %v306_v53 }
 0x384   :  { %309 = vrot.lane.b32.xlu0 %v307_v55, %s3206_s0 }
 0x3f6   :  { %v310_v58 = vpop.permute.xlu0 %309 }
 0x3f7   :  { %2545 = vmatmul.mubr.msk.bf16.vlgmr.msra.gmra.mrb[4].mxu1 %vm240_vm3, %v310_v58 }
 0x3f8   :  { %436 = vmatpush1.bf16.msra.mxu1 %v3372_v56  ;;  %467 = vmatprep.mubr.bf16.mxu1 %v3205_v0 }
 0x3f9   :  { %437 = vmatprep.subr.bf16.mxu1 %v3374_v57 }
 0x3fc   :  { %438 = vmatpush1.bf16.msra.mxu1 %v3378_v59 }
 0x3fd   :  { %439 = vmatprep.subr.bf16.mxu1 %v3382_v60 }
 0x400   :  { %440 = vmatpush1.bf16.msra.mxu1 %v3385_v61 }
 0x401   :  { %441 = vmatprep.subr.bf16.mxu1 %v3388_v62 }
 0x404   :  { %442 = vmatpush1.bf16.msra.mxu1 %v3391_v63 }
 0x405   :  { %624 = vmatprep.subr.bf16.mxu1 %v3340_v26 }
 0x407   :  { %2554 = vmatmul.mubr.msk.bf16.vlgmr.msra.gmra.mrb[8].mxu1 %vm240_vm3, %v3323_v5 }
 0x408   :  { %625 = vmatpush1.bf16.msra.mxu1 %v3342_v27  ;;  %656 = vmatprep.mubr.bf16.mxu1 %v3205_v0 }
 0x409   :  { %626 = vmatprep.subr.bf16.mxu1 %v3344_v29 }
 0x40c   :  { %627 = vmatpush1.bf16.msra.mxu1 %v3350_v31 }
 0x40d   :  { %628 = vmatprep.subr.bf16.mxu1 %v3353_v32 }
 0x410   :  { %629 = vmatpush1.bf16.msra.mxu1 %v3357_v33 }
 0x411   :  { %630 = vmatprep.subr.bf16.mxu1 %v3360_v34 }
 0x414   :  { %631 = vmatpush1.bf16.msra.mxu1 %v3363_v43 }
 0x415   :  { %785 = vmatprep.subr.bf16.mxu1 %v3281_v35 }
 0x4ca   :  { %v3407_v1 = vpop.f32.mrb[4].mxu1 }
 0x4cb   :  { %v3409_v2 = vpop.f32.mrb[5].mxu1 }
 0x4cc   :  { %v392_v3 = vpop.f32.mrb[6].mxu1 }
 0x4cd   :  { %v393_v4 = vpop.f32.mrb[7].mxu1 }
 0x4da   :  { %v469_v5 = vpop.f32.mrb[8].mxu1 }
 0x4db   :  { %v478_v6 = vrot.slane %v469_v5, 7  ;;  %v486_v8 = vadd.f32 %v469_v5, %v3266_v17  ;;  %v471_v9 = vpop.f32.mrb[9].mxu1 }
 0x4dc   :  { %v473_v11 = vpop.f32.mrb[10].mxu1  ;;  %v479_v19 = vrot.slane %v471_v9, 7  ;;  %v487_v20 = vadd.f32 %v471_v9, %v3273_v24 }
 0x4dd   :  { %v484_v12 = vadd.f32 %v478_v6, %v3264_v14  ;;  %v2556_v13 = vmul.f32 -1.442695, %v486_v8  ;;  %v474_v15 = vpop.f32.mrb[11].mxu1 }
 0x4de   :  { %v485_v23 = vadd.f32 %v479_v19, %v3276_v28  ;;  %v2558_v5 = vmul.f32 -1.442695, %v487_v20 }
 0x4df   :  { %v2555_v18 = vmul.f32 -1.442695, %v484_v12  ;;  %2878 = vpow2.f32 %v2556_v13 }
 0x4e0   :  { %v2557_v6 = vmul.f32 -1.442695, %v485_v23 }
 0x4e1   :  { %2880 = vpow2.f32 %v2555_v18 }
 0x4e2   :  { %2882 = vtanh.f32 %v487_v20 }
 0x4e9   :  { %v2879_v22 = vpop.eup %2878 }
 0x4ea   :  { %v495_v25 = vadd.f32 1.0, %v2879_v22 }
 0x4eb   :  { %v2881_v44 = vpop.eup %2880 }
 0x4ec   :  { %v494_v45 = vadd.f32 1.0, %v2881_v44  ;;  %2884 = vrcp.f32 %v495_v25  ;;  %v2883_v46 = vpop.eup %2882 }
 0x4ed   :  { %2886 = vtanh.f32 %v485_v23 }
 0x4ee   :  { %2888 = vrcp.f32 %v494_v45 }
 0x4ef   :  { %2890 = vpow2.f32 %v2558_v5 }
 0x4f0   :  { %2892 = vpow2.f32 %v2557_v6 }
 0x4f6   :  { %v2885_v48 = vpop.eup %2884 }
 0x4f7   :  { %v2887_v51 = vpop.eup %2886  ;;  %v523_v53 = vmul.f32 %v2885_v48, %v2883_v46  ;;  %v521_v55 = vmul.f32 %v2885_v48, %v517_v47 }
 0x4f8   :  { %v2889_v58 = vpop.eup %2888 }
 0x4f9   :  { %528 = vrot.lane.b32.xlu0 %v523_v53, %s3206_s0  ;;  %v522_v3 = vmul.f32 %v2889_v58, %v2887_v51  ;;  %v520_v4 = vmul.f32 %v2889_v58, %v516_v52  ;;  %v2891_v8 = vpop.eup %2890  ;;  %v2718_v58 = vadd.f32 %v3409_v2, %v3336_v16 }
 0x4fa   :  { %v2893_v9 = vpop.eup %2892  ;;  %v509_v50 = vadd.f32 1.0, %v2891_v8 }
 0x4fb   :  { %526 = vrot.lane.b32.xlu1 %v522_v3, %s3206_s0  ;;  %v508_v11 = vadd.f32 1.0, %v2893_v9 }
 0x4fc   :  { %2894 = vrcp.f32 %v509_v50 }
 0x506   :  { %v2895_v18 = vpop.eup %2894 }
 0x56b   :  { %v529_v12 = vpop.permute.xlu0 %528 }
 0x56c   :  { %v3419_v13 = vadd.f32 %v529_v12, %v521_v55  ;;  %v2716_v55 = vadd.f32 %v3407_v1, %v3332_v7 }
 0x56d   :  { %v527_v54 = vpop.permute.xlu1 %526 }
 0x56e   :  { %2896 = vtanh.f32 %v3419_v13  ;;  %v3422_v15 = vadd.f32 %v527_v54, %v520_v4 }
 0x56f   :  { %2898 = vrcp.f32 %v508_v11 }
 0x570   :  { %2900 = vtanh.f32 %v3422_v15 }
 0x578   :  { %v2897_v19 = vpop.eup %2896 }
 0x579   :  { %v2899_v20 = vpop.eup %2898  ;;  %v537_v22 = vmul.f32 %v2897_v19, %v2895_v18 }
 0x57a   :  { %v2901_v23 = vpop.eup %2900 }
 0x57b   :  { %v536_v25 = vmul.f32 %v2901_v23, %v2899_v20  ;;  %v539_v45 = vpack.c.bf16 %v537_v22, %v537_v22 }
 0x57d   :  { %v538_v44 = vpack.c.bf16 %v536_v25, %v536_v25  ;;  %v543_v47 = vunpack.c.l.b16 %v539_v45 }
 0x57f   :  { %v542_v46 = vunpack.c.l.b16 %v538_v44 }
 0x581   :  { %v544_v48 = vrot.slane %v542_v46, 1 }
 0x583   :  { %v545_v51 = vsel %vm195_vm2, %v543_v47, %v544_v48 }
 0x584   :  { %v546_v52 = vpack.c.b16 %v545_v51, %v545_v51 }
 0x586   :  { %547 = vrot.lane.b32.xlu1 %v546_v52, %s3206_s0 }
 0x5f8   :  { %v548_v53 = vpop.permute.xlu1 %547 }
 0x5f9   :  { %2559 = vmatmul.mubr.msk.bf16.vlgmr.msra.gmra.mrb[4].mxu0 %vm240_vm3, %v548_v53 }
 0x5fa   :  { %666 = vmatpush1.bf16.msra.mxu0 %v3372_v56  ;;  %697 = vmatprep.mubr.bf16.mxu0 %v3205_v0 }
 0x5fb   :  { %667 = vmatprep.subr.bf16.mxu0 %v3374_v57 }
 0x5fe   :  { %668 = vmatpush1.bf16.msra.mxu0 %v3378_v59 }
 0x5ff   :  { %669 = vmatprep.subr.bf16.mxu0 %v3382_v60 }
 0x602   :  { %670 = vmatpush1.bf16.msra.mxu0 %v3385_v61 }
 0x603   :  { %671 = vmatprep.subr.bf16.mxu0 %v3388_v62 }
 0x606   :  { %672 = vmatpush1.bf16.msra.mxu0 %v3391_v63 }
 0x607   :  { %857 = vmatprep.subr.bf16.mxu0 %v3340_v26 }
 0x609   :  { %2563 = vmatmul.mubr.msk.bf16.vlgmr.msra.gmra.mrb[8].mxu0 %vm240_vm3, %v548_v53 }
 0x60a   :  { %858 = vmatpush1.bf16.msra.mxu0 %v3342_v27  ;;  %889 = vmatprep.mubr.bf16.mxu0 %v3205_v0 }
 0x60b   :  { %859 = vmatprep.subr.bf16.mxu0 %v3344_v29 }
 0x60e   :  { %860 = vmatpush1.bf16.msra.mxu0 %v3350_v31 }
 0x60f   :  { %861 = vmatprep.subr.bf16.mxu0 %v3353_v32 }
 0x612   :  { %862 = vmatpush1.bf16.msra.mxu0 %v3357_v33 }
 0x613   :  { %863 = vmatprep.subr.bf16.mxu0 %v3360_v34 }
 0x616   :  { %864 = vmatpush1.bf16.msra.mxu0 %v3363_v43 }
 0x617   :  { %1018 = vmatprep.subr.bf16.mxu0 %v3281_v35 }
 0x6cc   :  { %v586_v3 = vpop.f32.mrb[4].mxu0 }
 0x6cd   :  { %v2717_v4 = vadd.f32 %v2716_v55, %v586_v3  ;;  %v588_v5 = vpop.f32.mrb[5].mxu0 }
 0x6ce   :  { %v2719_v6 = vadd.f32 %v2718_v58, %v588_v5  ;;  %v590_v8 = vpop.f32.mrb[6].mxu0 }
 0x6cf   :  { %v2560_v9 = vmul.f32 -1.442695, %v2717_v4  ;;  %v591_v50 = vpop.f32.mrb[7].mxu0 }
 0x6d1   :  { %2902 = vpow2.f32 %v2560_v9  ;;  %v748_v9 = vrot.slane %v3422_v15, 7 }
 0x6d2   :  { %2904 = vtanh.f32 %v2719_v6 }
 0x6db   :  { %v2903_v11 = vpop.eup %2902 }
 0x6dc   :  { %v598_v12 = vadd.f32 1.0, %v2903_v11  ;;  %v699_v54 = vpop.f32.mrb[8].mxu0  ;;  %v2905_v46 = vpop.eup %2904  ;;  %v749_v11 = vrot.slane %v3419_v13, 7 }
 0x6dd   :  { %v708_v18 = vrot.slane %v699_v54, 6  ;;  %v710_v19 = vrot.slane %v699_v54, 7  ;;  %v701_v20 = vpop.f32.mrb[9].mxu0 }
 0x6de   :  { %2906 = vrcp.f32 %v598_v12  ;;  %v703_v1 = vpop.f32.mrb[10].mxu0  ;;  %v709_v45 = vrot.slane %v701_v20, 6  ;;  %v711_v47 = vrot.slane %v701_v20, 7 }
 0x6df   :  { %v716_v22 = vadd.f32 %v708_v18, %v3264_v14  ;;  %v718_v2 = vadd.f32 %v710_v19, %v3266_v17  ;;  %v704_v23 = vpop.f32.mrb[11].mxu0  ;;  %v2561_v1 = vmul.f32 -1.442695, %v2719_v6 }
 0x6e0   :  { %v717_v52 = vadd.f32 %v709_v45, %v3276_v28  ;;  %v719_v53 = vadd.f32 %v711_v47, %v3273_v24 }
 0x6e1   :  { %v2564_v25 = vmul.f32 -1.442695, %v716_v22  ;;  %v2565_v44 = vmul.f32 -1.442695, %v718_v2 }
 0x6e2   :  { %v2566_v23 = vmul.f32 -1.442695, %v717_v52 }
 0x6e3   :  { %2908 = vpow2.f32 %v2564_v25  ;;  %v2567_v25 = vmul.f32 -1.442695, %v719_v53 }
 0x6e4   :  { %2910 = vpow2.f32 %v2565_v44 }
 0x6e5   :  { %2912 = vtanh.f32 %v717_v52 }
 0x6e6   :  { %2914 = vtanh.f32 %v719_v53 }
 0x6e8   :  { %v2907_v48 = vpop.eup %2906 }
 0x6e9   :  { %v609_v51 = vmul.f32 %v2907_v48, %v2905_v46  ;;  %v608_v15 = vmul.f32 %v2907_v48, %v3368_v49 }
 0x6eb   :  { %611 = vrot.lane.b32.xlu0 %v609_v51, %s3206_s0 }
 0x6ed   :  { %v2909_v55 = vpop.eup %2908 }
 0x6ee   :  { %v2911_v58 = vpop.eup %2910  ;;  %v726_v3 = vadd.f32 1.0, %v2909_v55 }
 0x6ef   :  { %v727_v4 = vadd.f32 1.0, %v2911_v58  ;;  %v2913_v5 = vpop.eup %2912 }
 0x6f0   :  { %2916 = vrcp.f32 %v726_v3  ;;  %v2915_v8 = vpop.eup %2914 }
 0x6f1   :  { %2918 = vrcp.f32 %v727_v4 }
 0x6f2   :  { %2920 = vpow2.f32 %v2561_v1 }
 0x6fa   :  { %v2917_v50 = vpop.eup %2916 }
 0x6fb   :  { %v2919_v12 = vpop.eup %2918  ;;  %v754_v54 = vmul.f32 %v2917_v50, %v2913_v5  ;;  %v752_v18 = vmul.f32 %v2917_v50, %v748_v9 }
 0x6fc   :  { %v755_v19 = vmul.f32 %v2919_v12, %v2915_v8  ;;  %v753_v20 = vmul.f32 %v2919_v12, %v749_v11  ;;  %v2921_v22 = vpop.eup %2920 }
 0x6fd   :  { %758 = vrot.lane.b32.xlu1 %v754_v54, %s3206_s0  ;;  %v605_v2 = vadd.f32 1.0, %v2921_v22 }
 0x6fe   :  { %760 = vrot.lane.b32.xlu0 %v755_v19, %s3206_s0 }
 0x6ff   :  { %2922 = vrcp.f32 %v605_v2 }
 0x700   :  { %2924 = vpow2.f32 %v2566_v23 }
 0x701   :  { %2926 = vpow2.f32 %v2567_v25 }
 0x709   :  { %v2923_v45 = vpop.eup %2922 }
 0x70a   :  { %v2925_v46 = vpop.eup %2924 }
 0x70b   :  { %v2927_v47 = vpop.eup %2926  ;;  %v740_v55 = vadd.f32 1.0, %v2925_v46 }
 0x70c   :  { %v741_v58 = vadd.f32 1.0, %v2927_v47 }
 0x75d   :  { %v612_v44 = vpop.permute.xlu0 %611 }
 0x75e   :  { %v3461_v13 = vadd.f32 %v612_v44, %v608_v15 }
 0x760   :  { %2928 = vtanh.f32 %v3461_v13 }
 0x761   :  { %2930 = vrcp.f32 %v740_v55 }
 0x762   :  { %2932 = vrcp.f32 %v741_v58 }
 0x76a   :  { %v2929_v51 = vpop.eup %2928 }
 0x76b   :  { %v616_v6 = vmul.f32 %v2929_v51, %v2923_v45  ;;  %v2931_v4 = vpop.eup %2930 }
 0x76c   :  { %v2933_v5 = vpop.eup %2932 }
 0x76d   :  { %v617_v3 = vpack.c.bf16 %v616_v6, %v616_v6 }
 0x76f   :  { %v759_v52 = vpop.permute.xlu1 %758  ;;  %619 = vrot.lane.b32.xlu1 %v617_v3, %s3206_s0 }
 0x770   :  { %v761_v49 = vpop.permute.xlu0 %760  ;;  %v3465_v48 = vadd.f32 %v759_v52, %v752_v18 }
 0x771   :  { %v3467_v53 = vadd.f32 %v761_v49, %v753_v20 }
 0x772   :  { %2934 = vtanh.f32 %v3465_v48 }
 0x773   :  { %2936 = vtanh.f32 %v3467_v53 }
 0x77c   :  { %v2935_v8 = vpop.eup %2934 }
 0x77d   :  { %v2937_v9 = vpop.eup %2936  ;;  %v768_v50 = vmul.f32 %v2935_v8, %v2931_v4 }
 0x77e   :  { %v769_v11 = vmul.f32 %v2937_v9, %v2933_v5 }
 0x77f   :  { %v770_v12 = vpack.c.bf16 %v768_v50, %v768_v50 }
 0x780   :  { %v771_v54 = vpack.c.bf16 %v769_v11, %v769_v11 }
 0x781   :  { %v774_v19 = vunpack.c.l.b16 %v770_v12 }
 0x782   :  { %v775_v1 = vunpack.c.l.b16 %v771_v54 }
 0x783   :  { %v776_v22 = vrot.slane %v774_v19, 2 }
 0x784   :  { %v777_v18 = vrot.slane %v775_v1, 1 }
 0x786   :  { %v778_v2 = vsel %vm195_vm2, %v777_v18, %v776_v22 }
 0x787   :  { %v779_v20 = vpack.c.b16 %v778_v2, %v778_v2 }
 0x789   :  { %780 = vrot.lane.b32.xlu0 %v779_v20, %s3206_s0 }
 0x7e1   :  { %v620_v23 = vpop.permute.xlu1 %619 }
 0x7e2   :  { %2562 = vmatmul.mubr.msk.bf16.vlgmr.msra.gmra.mrb[12].mxu1 %vm240_vm3, %v620_v23 }
 0x7e3   :  { %786 = vmatpush1.bf16.msra.mxu1 %v3283_v36  ;;  %817 = vmatprep.mubr.bf16.mxu1 %v3205_v0 }
 0x7e4   :  { %787 = vmatprep.subr.bf16.mxu1 %v3285_v37 }
 0x7e7   :  { %788 = vmatpush1.bf16.msra.mxu1 %v3290_v38 }
 0x7e8   :  { %789 = vmatprep.subr.bf16.mxu1 %v3294_v39 }
 0x7eb   :  { %790 = vmatpush1.bf16.msra.mxu1 %v3298_v40 }
 0x7ec   :  { %791 = vmatprep.subr.bf16.mxu1 %v3302_v41 }
 0x7ef   :  { %792 = vmatpush1.bf16.msra.mxu1 %v3306_v42 }
 0x7f0   :  { %898 = vmatprep.subr.bf16.mxu1 %v3347_v30 }
 0x7fb   :  { %v781_v25 = vpop.permute.xlu0 %780 }
 0x7fc   :  { %2568 = vmatmul.mubr.msk.bf16.vlgmr.msra.gmra.mrb[12].mxu1 %vm240_vm3, %v781_v25 }
 0x7fd   :  { %899 = vmatpush1.bf16.msra.mxu1 %v3372_v56  ;;  %930 = vmatprep.mubr.bf16.mxu1 %v3205_v0 }
 0x7fe   :  { %900 = vmatprep.subr.bf16.mxu1 %v3374_v57 }
 0x801   :  { %901 = vmatpush1.bf16.msra.mxu1 %v3378_v59 }
 0x802   :  { %902 = vmatprep.subr.bf16.mxu1 %v3382_v60 }
 0x805   :  { %903 = vmatpush1.bf16.msra.mxu1 %v3385_v61 }
 0x806   :  { %904 = vmatprep.subr.bf16.mxu1 %v3388_v62 }
 0x809   :  { %905 = vmatpush1.bf16.msra.mxu1 %v3391_v63 }
 0x80a   :  { %1090 = vmatprep.subr.bf16.mxu1 %v3340_v26 }
 0x80c   :  { %2572 = vmatmul.mubr.msk.bf16.vlgmr.msra.gmra.mrb[16].mxu1 %vm240_vm3, %v781_v25 }
 0x80d   :  { %1091 = vmatpush1.bf16.msra.mxu1 %v3342_v27  ;;  %1122 = vmatprep.mubr.bf16.mxu1 %v3205_v0 }
 0x80e   :  { %1092 = vmatprep.subr.bf16.mxu1 %v3344_v29 }
 0x811   :  { %1093 = vmatpush1.bf16.msra.mxu1 %v3350_v31 }
 0x812   :  { %1094 = vmatprep.subr.bf16.mxu1 %v3353_v32 }
 0x815   :  { %1095 = vmatpush1.bf16.msra.mxu1 %v3357_v33 }
 0x816   :  { %1096 = vmatprep.subr.bf16.mxu1 %v3360_v34 }
 0x819   :  { %1097 = vmatpush1.bf16.msra.mxu1 %v3363_v43 }
 0x81a   :  { %1251 = vmatprep.subr.bf16.mxu1 %v3281_v35 }
 0x8cf   :  { %v819_v15 = vpop.f32.mrb[12].mxu1 }
 0x8d0   :  { %v820_v44 = vadd.f32 %v819_v15, %v3332_v7  ;;  %v821_v45 = vpop.f32.mrb[13].mxu1 }
 0x8d1   :  { %v823_v46 = vpop.f32.mrb[14].mxu1  ;;  %v822_v6 = vadd.f32 %v821_v45, %v3336_v16 }
 0x8d2   :  { %v2569_v47 = vmul.f32 -1.442695, %v820_v44  ;;  %v824_v51 = vpop.f32.mrb[15].mxu1 }
 0x8d4   :  { %2938 = vpow2.f32 %v2569_v47  ;;  %v981_v47 = vrot.slane %v3465_v48, 7 }
 0x8d5   :  { %2940 = vtanh.f32 %v822_v6 }
 0x8de   :  { %v2939_v55 = vpop.eup %2938 }
 0x8df   :  { %v831_v58 = vadd.f32 1.0, %v2939_v55  ;;  %v932_v3 = vpop.f32.mrb[16].mxu1  ;;  %v2941_v19 = vpop.eup %2940  ;;  %v982_v55 = vrot.slane %v3467_v53, 7 }
 0x8e0   :  { %v941_v52 = vrot.slane %v932_v3, 5  ;;  %v943_v49 = vrot.slane %v932_v3, 6  ;;  %v934_v4 = vpop.f32.mrb[17].mxu1 }
 0x8e1   :  { %2942 = vrcp.f32 %v831_v58  ;;  %v936_v5 = vpop.f32.mrb[18].mxu1  ;;  %v942_v54 = vrot.slane %v934_v4, 5  ;;  %v944_v1 = vrot.slane %v934_v4, 6 }
 0x8e2   :  { %v949_v8 = vadd.f32 %v941_v52, %v3264_v14  ;;  %v951_v9 = vadd.f32 %v943_v49, %v3266_v17  ;;  %v937_v50 = vpop.f32.mrb[19].mxu1  ;;  %v2570_v5 = vmul.f32 -1.442695, %v822_v6 }
 0x8e3   :  { %v950_v2 = vadd.f32 %v942_v54, %v3276_v28  ;;  %v952_v20 = vadd.f32 %v944_v1, %v3273_v24 }
 0x8e4   :  { %v2573_v11 = vmul.f32 -1.442695, %v949_v8  ;;  %v2574_v12 = vmul.f32 -1.442695, %v951_v9 }
 0x8e5   :  { %v2575_v50 = vmul.f32 -1.442695, %v950_v2 }
 0x8e6   :  { %2944 = vpow2.f32 %v2573_v11  ;;  %v2576_v11 = vmul.f32 -1.442695, %v952_v20 }
 0x8e7   :  { %2946 = vpow2.f32 %v2574_v12 }
 0x8e8   :  { %2948 = vtanh.f32 %v950_v2 }
 0x8e9   :  { %2950 = vtanh.f32 %v952_v20 }
 0x8eb   :  { %v2943_v22 = vpop.eup %2942 }
 0x8ec   :  { %v842_v18 = vmul.f32 %v2943_v22, %v2941_v19  ;;  %v841_v48 = vmul.f32 %v2943_v22, %v3461_v13 }
 0x8ee   :  { %844 = vrot.lane.b32.xlu1 %v842_v18, %s3206_s0 }
 0x8f0   :  { %v2945_v23 = vpop.eup %2944 }
 0x8f1   :  { %v2947_v25 = vpop.eup %2946  ;;  %v959_v15 = vadd.f32 1.0, %v2945_v23 }
 0x8f2   :  { %v960_v44 = vadd.f32 1.0, %v2947_v25  ;;  %v2949_v45 = vpop.eup %2948 }
 0x8f3   :  { %2952 = vrcp.f32 %v959_v15  ;;  %v2951_v46 = vpop.eup %2950 }
 0x8f4   :  { %2954 = vrcp.f32 %v960_v44 }
 0x8f5   :  { %2956 = vpow2.f32 %v2570_v5 }
 0x8fd   :  { %v2953_v51 = vpop.eup %2952 }
 0x8fe   :  { %v2955_v58 = vpop.eup %2954  ;;  %v987_v3 = vmul.f32 %v2953_v51, %v2949_v45  ;;  %v985_v52 = vmul.f32 %v2953_v51, %v981_v47 }
 0x8ff   :  { %v988_v49 = vmul.f32 %v2955_v58, %v2951_v46  ;;  %v986_v4 = vmul.f32 %v2955_v58, %v982_v55  ;;  %v2957_v8 = vpop.eup %2956 }
 0x900   :  { %991 = vrot.lane.b32.xlu0 %v987_v3, %s3206_s0  ;;  %v838_v9 = vadd.f32 1.0, %v2957_v8 }
 0x901   :  { %993 = vrot.lane.b32.xlu1 %v988_v49, %s3206_s0 }
 0x902   :  { %2958 = vrcp.f32 %v838_v9 }
 0x903   :  { %2960 = vpow2.f32 %v2575_v50 }
 0x904   :  { %2962 = vpow2.f32 %v2576_v11 }
 0x90c   :  { %v2959_v54 = vpop.eup %2958 }
 0x90d   :  { %v2961_v19 = vpop.eup %2960 }
 0x90e   :  { %v2963_v1 = vpop.eup %2962  ;;  %v973_v23 = vadd.f32 1.0, %v2961_v19 }
 0x90f   :  { %v974_v25 = vadd.f32 1.0, %v2963_v1 }
 0x960   :  { %v845_v12 = vpop.permute.xlu1 %844 }
 0x961   :  { %v3515_v53 = vadd.f32 %v845_v12, %v841_v48 }
 0x963   :  { %2964 = vtanh.f32 %v3515_v53 }
 0x964   :  { %2966 = vrcp.f32 %v973_v23 }
 0x965   :  { %2968 = vrcp.f32 %v974_v25 }
 0x96d   :  { %v2965_v18 = vpop.eup %2964 }
 0x96e   :  { %v849_v6 = vmul.f32 %v2965_v18, %v2959_v54  ;;  %v2967_v44 = vpop.eup %2966 }
 0x96f   :  { %v2969_v45 = vpop.eup %2968 }
 0x970   :  { %v850_v15 = vpack.c.bf16 %v849_v6, %v849_v6 }
 0x972   :  { %v992_v2 = vpop.permute.xlu0 %991  ;;  %852 = vrot.lane.b32.xlu0 %v850_v15, %s3206_s0 }
 0x973   :  { %v3519_v13 = vadd.f32 %v992_v2, %v985_v52  ;;  %v994_v22 = vpop.permute.xlu1 %993 }
 0x974   :  { %v3521_v20 = vadd.f32 %v994_v22, %v986_v4 }
 0x975   :  { %2970 = vtanh.f32 %v3519_v13 }
 0x976   :  { %2972 = vtanh.f32 %v3521_v20 }
 0x97f   :  { %v2971_v46 = vpop.eup %2970 }
 0x980   :  { %v2973_v47 = vpop.eup %2972  ;;  %v1001_v51 = vmul.f32 %v2971_v46, %v2967_v44 }
 0x981   :  { %v1002_v55 = vmul.f32 %v2973_v47, %v2969_v45  ;;  %v1214_v47 = vrot.slane %v3519_v13, 7 }
 0x982   :  { %v1003_v58 = vpack.c.bf16 %v1001_v51, %v1001_v51 }
 0x983   :  { %v1004_v3 = vpack.c.bf16 %v1002_v55, %v1002_v55  ;;  %v1215_v55 = vrot.slane %v3521_v20, 7 }
 0x984   :  { %v1007_v49 = vunpack.c.l.b16 %v1003_v58 }
 0x985   :  { %v1008_v5 = vunpack.c.l.b16 %v1004_v3 }
 0x986   :  { %v1009_v52 = vrot.slane %v1007_v49, 3 }
 0x987   :  { %v1010_v8 = vrot.slane %v1008_v5, 2 }
 0x989   :  { %v1011_v9 = vsel %vm195_vm2, %v1010_v8, %v1009_v52 }
 0x98a   :  { %v1012_v4 = vpack.c.b16 %v1011_v9, %v1011_v9 }
 0x98c   :  { %1013 = vrot.lane.b32.xlu1 %v1012_v4, %s3206_s0 }
 0x9e4   :  { %v853_v50 = vpop.permute.xlu0 %852 }
 0x9e5   :  { %2571 = vmatmul.mubr.msk.bf16.vlgmr.msra.gmra.mrb[12].mxu0 %vm240_vm3, %v853_v50 }
 0x9e6   :  { %1019 = vmatpush1.bf16.msra.mxu0 %v3283_v36  ;;  %1050 = vmatprep.mubr.bf16.mxu0 %v3205_v0 }
 0x9e7   :  { %1020 = vmatprep.subr.bf16.mxu0 %v3285_v37 }
 0x9ea   :  { %1021 = vmatpush1.bf16.msra.mxu0 %v3290_v38 }
 0x9eb   :  { %1022 = vmatprep.subr.bf16.mxu0 %v3294_v39 }
 0x9ee   :  { %1023 = vmatpush1.bf16.msra.mxu0 %v3298_v40 }
 0x9ef   :  { %1024 = vmatprep.subr.bf16.mxu0 %v3302_v41 }
 0x9f2   :  { %1025 = vmatpush1.bf16.msra.mxu0 %v3306_v42 }
 0x9f3   :  { %1131 = vmatprep.subr.bf16.mxu0 %v3347_v30 }
 0x9fe   :  { %v1014_v11 = vpop.permute.xlu1 %1013 }
 0x9ff   :  { %2577 = vmatmul.mubr.msk.bf16.vlgmr.msra.gmra.mrb[12].mxu0 %vm240_vm3, %v1014_v11 }
 0xa00   :  { %1132 = vmatpush1.bf16.msra.mxu0 %v3372_v56  ;;  %1163 = vmatprep.mubr.bf16.mxu0 %v3205_v0 }
 0xa01   :  { %1133 = vmatprep.subr.bf16.mxu0 %v3374_v57 }
 0xa04   :  { %1134 = vmatpush1.bf16.msra.mxu0 %v3378_v59 }
 0xa05   :  { %1135 = vmatprep.subr.bf16.mxu0 %v3382_v60 }
 0xa08   :  { %1136 = vmatpush1.bf16.msra.mxu0 %v3385_v61 }
 0xa09   :  { %1137 = vmatprep.subr.bf16.mxu0 %v3388_v62 }
 0xa0c   :  { %1138 = vmatpush1.bf16.msra.mxu0 %v3391_v63 }
 0xa0d   :  { %1323 = vmatprep.subr.bf16.mxu0 %v3340_v26 }
 0xa0f   :  { %2581 = vmatmul.mubr.msk.bf16.vlgmr.msra.gmra.mrb[16].mxu0 %vm240_vm3, %v1014_v11 }
 0xa10   :  { %1324 = vmatpush1.bf16.msra.mxu0 %v3342_v27  ;;  %1355 = vmatprep.mubr.bf16.mxu0 %v3205_v0 }
 0xa11   :  { %1325 = vmatprep.subr.bf16.mxu0 %v3344_v29 }
 0xa14   :  { %1326 = vmatpush1.bf16.msra.mxu0 %v3350_v31 }
 0xa15   :  { %1327 = vmatprep.subr.bf16.mxu0 %v3353_v32 }
 0xa18   :  { %1328 = vmatpush1.bf16.msra.mxu0 %v3357_v33 }
 0xa19   :  { %1329 = vmatprep.subr.bf16.mxu0 %v3360_v34 }
 0xa1c   :  { %1330 = vmatpush1.bf16.msra.mxu0 %v3363_v43 }
 0xa1d   :  { %1484 = vmatprep.subr.bf16.mxu0 %v3281_v35 }
 0xad2   :  { %v1052_v36 = vpop.f32.mrb[12].mxu0 }
 0xad3   :  { %v1053_v37 = vadd.f32 %v1052_v36, %v3332_v7  ;;  %v1054_v38 = vpop.f32.mrb[13].mxu0 }
 0xad4   :  { %v1056_v39 = vpop.f32.mrb[14].mxu0  ;;  %v1055_v42 = vadd.f32 %v1054_v38, %v3336_v16 }
 0xad5   :  { %v2578_v40 = vmul.f32 -1.442695, %v1053_v37  ;;  %v1057_v41 = vpop.f32.mrb[15].mxu0 }
 0xad6   :  { %v2579_v8 = vmul.f32 -1.442695, %v1055_v42 }
 0xad7   :  { %2974 = vpow2.f32 %v2578_v40 }
 0xad8   :  { %2976 = vtanh.f32 %v1055_v42 }
 0xae1   :  { %v2975_v26 = vpop.eup %2974 }
 0xae2   :  { %v1064_v27 = vadd.f32 1.0, %v2975_v26  ;;  %v1165_v29 = vpop.f32.mrb[16].mxu0  ;;  %v2977_v19 = vpop.eup %2976 }
 0xae3   :  { %v1174_v30 = vrot.slane %v1165_v29, 4  ;;  %v1176_v31 = vrot.slane %v1165_v29, 5  ;;  %v1167_v32 = vpop.f32.mrb[17].mxu0 }
 0xae4   :  { %2978 = vrcp.f32 %v1064_v27  ;;  %v1169_v33 = vpop.f32.mrb[18].mxu0  ;;  %v1175_v54 = vrot.slane %v1167_v32, 4  ;;  %v1177_v1 = vrot.slane %v1167_v32, 5 }
 0xae5   :  { %v1182_v35 = vadd.f32 %v1174_v30, %v3264_v14  ;;  %v1184_v34 = vadd.f32 %v1176_v31, %v3266_v17  ;;  %v1170_v43 = vpop.f32.mrb[19].mxu0 }
 0xae6   :  { %v1183_v23 = vadd.f32 %v1175_v54, %v3276_v28  ;;  %v1185_v25 = vadd.f32 %v1177_v1, %v3273_v24 }
 0xae7   :  { %v2582_v48 = vmul.f32 -1.442695, %v1182_v35  ;;  %v2583_v12 = vmul.f32 -1.442695, %v1184_v34 }
 0xae8   :  { %v2584_v50 = vmul.f32 -1.442695, %v1183_v23  ;;  %v2585_v11 = vmul.f32 -1.442695, %v1185_v25 }
 0xae9   :  { %2980 = vpow2.f32 %v2582_v48 }
 0xaea   :  { %2982 = vpow2.f32 %v2583_v12 }
 0xaeb   :  { %2984 = vtanh.f32 %v1183_v23 }
 0xaec   :  { %2986 = vtanh.f32 %v1185_v25 }
 0xaee   :  { %v2979_v18 = vpop.eup %2978 }
 0xaef   :  { %v1075_v6 = vmul.f32 %v2979_v18, %v2977_v19  ;;  %v1074_v13 = vmul.f32 %v2979_v18, %v3515_v53 }
 0xaf1   :  { %1077 = vrot.lane.b32.xlu0 %v1075_v6, %s3206_s0 }
 0xaf3   :  { %v2981_v15 = vpop.eup %2980 }
 0xaf4   :  { %v2983_v2 = vpop.eup %2982  ;;  %v1192_v22 = vadd.f32 1.0, %v2981_v15 }
 0xaf5   :  { %v1193_v44 = vadd.f32 1.0, %v2983_v2  ;;  %v2985_v45 = vpop.eup %2984  ;;  %v3582_v2 = vld [vmem:[#allocation2 + $0x10] ss:$56 sps:$4 sm:$0xff]  }
 0xaf6   :  { %2988 = vrcp.f32 %v1192_v22  ;;  %v2987_v46 = vpop.eup %2986  ;;  %v3586_v22 = vld [vmem:[#allocation2 + $0x84] ss:$56 sps:$4 sm:$0xff]  }
 0xaf7   :  { %2990 = vrcp.f32 %v1193_v44  ;;  %v3589_v44 = vld [vmem:[#allocation2 + $0x80] ss:$56 sps:$4 sm:$0xff]  }
 0xaf8   :  { %2992 = vpow2.f32 %v2579_v8 }
 0xb00   :  { %v2989_v51 = vpop.eup %2988 }
 0xb01   :  { %v2991_v58 = vpop.eup %2990  ;;  %v1220_v3 = vmul.f32 %v2989_v51, %v2985_v45  ;;  %v1218_v49 = vmul.f32 %v2989_v51, %v1214_v47  ;;  %v3592_v45 = vld [vmem:[#allocation2 + $0xf4] ss:$56 sps:$4 sm:$0xff]   ;;  %v3598_v47 = vld [vmem:[#allocation2 + $0x164] ss:$56 sps:$4 sm:$0xff]   ;;  %v3601_v51 = vld [vmem:[#allocation2 + $0x160] ss:$56 sps:$4 sm:$0xff]  }
 0xb02   :  { %v1221_v5 = vmul.f32 %v2991_v58, %v2987_v46  ;;  %v1219_v52 = vmul.f32 %v2991_v58, %v1215_v55  ;;  %v2993_v9 = vpop.eup %2992  ;;  %v3595_v46 = vld [vmem:[#allocation2 + $0xf0] ss:$56 sps:$4 sm:$0xff]   ;;  %v3604_v55 = vld [vmem:[#allocation2 + $0xc] ss:$56 sps:$4 sm:$0xff]  }
 0xb03   :  { %1224 = vrot.lane.b32.xlu1 %v1220_v3, %s3206_s0  ;;  %v1071_v4 = vadd.f32 1.0, %v2993_v9  ;;  %v3616_v3 = vld [vmem:[#allocation2 + $0x1c] ss:$56 sps:$4 sm:$0xff]  }
 0xb04   :  { %1226 = vrot.lane.b32.xlu0 %v1221_v5, %s3206_s0 }
 0xb05   :  { %2994 = vrcp.f32 %v1071_v4 }
 0xb06   :  { %2996 = vpow2.f32 %v2584_v50 }
 0xb07   :  { %2998 = vpow2.f32 %v2585_v11 }
 0xb0f   :  { %v2995_v37 = vpop.eup %2994 }
 0xb10   :  { %v2997_v38 = vpop.eup %2996 }
 0xb11   :  { %v2999_v39 = vpop.eup %2998  ;;  %v1206_v42 = vadd.f32 1.0, %v2997_v38 }
 0xb12   :  { %v1207_v26 = vadd.f32 1.0, %v2999_v39 }
 0xb63   :  { %v1078_v36 = vpop.permute.xlu0 %1077 }
 0xb64   :  { %v3569_v20 = vadd.f32 %v1078_v36, %v1074_v13 }
 0xb66   :  { %3000 = vtanh.f32 %v3569_v20 }
 0xb67   :  { %3002 = vrcp.f32 %v1206_v42 }
 0xb68   :  { %3004 = vrcp.f32 %v1207_v26 }
 0xb70   :  { %v3001_v40 = vpop.eup %3000 }
 0xb71   :  { %v1082_v41 = vmul.f32 %v3001_v40, %v2995_v37  ;;  %v3003_v32 = vpop.eup %3002 }
 0xb72   :  { %v3005_v33 = vpop.eup %3004 }
 0xb73   :  { %v1083_v27 = vpack.c.bf16 %v1082_v41, %v1082_v41 }
 0xb75   :  { %v1225_v29 = vpop.permute.xlu1 %1224  ;;  %1085 = vrot.lane.b32.xlu1 %v1083_v27, %s3206_s0 }
 0xb76   :  { %v3573_v53 = vadd.f32 %v1225_v29, %v1218_v49  ;;  %v1227_v30 = vpop.permute.xlu0 %1226  ;;  %v3642_v49 = vld [vmem:[#allocation2 + $0x14] ss:$56 sps:$4 sm:$0xff]  }
 0xb77   :  { %v3575_v31 = vadd.f32 %v1227_v30, %v1219_v52 }
 0xb78   :  { %3006 = vtanh.f32 %v3573_v53 }
 0xb79   :  { %3008 = vtanh.f32 %v3575_v31 }
 0xb82   :  { %v3007_v35 = vpop.eup %3006 }
 0xb83   :  { %v3009_v34 = vpop.eup %3008  ;;  %v1234_v43 = vmul.f32 %v3007_v35, %v3003_v32 }
 0xb84   :  { %v1235_v48 = vmul.f32 %v3009_v34, %v3005_v33 }
 0xb85   :  { %v1236_v12 = vpack.c.bf16 %v1234_v43, %v1234_v43 }
 0xb86   :  { %v1237_v54 = vpack.c.bf16 %v1235_v48, %v1235_v48 }
 0xb87   :  { %v1240_v19 = vunpack.c.l.b16 %v1236_v12 }
 0xb88   :  { %v1241_v1 = vunpack.c.l.b16 %v1237_v54 }
 0xb89   :  { %v1242_v18 = vrot.slane %v1240_v19, 4 }
 0xb8a   :  { %v1243_v6 = vrot.slane %v1241_v1, 3 }
 0xb8c   :  { %v1244_v23 = vsel %vm195_vm2, %v1243_v6, %v1242_v18 }
 0xb8d   :  { %v1245_v25 = vpack.c.b16 %v1244_v23, %v1244_v23 }
 0xb8f   :  { %1246 = vrot.lane.b32.xlu0 %v1245_v25, %s3206_s0  ;;  %v1447_v25 = vrot.slane %v3573_v53, 7 }
 0xbe7   :  { %v1086_v15 = vpop.permute.xlu1 %1085 }
 0xbe8   :  { %2580 = vmatmul.mubr.msk.bf16.vlgmr.msra.gmra.mrb[20].mxu1 %vm240_vm3, %v1086_v15 }
 0xbe9   :  { %1252 = vmatpush1.bf16.msra.mxu1 %v3582_v2  ;;  %1283 = vmatprep.mubr.bf16.mxu1 %v3205_v0 }
 0xbea   :  { %1253 = vmatprep.subr.bf16.mxu1 %v3586_v22 }
 0xbed   :  { %1254 = vmatpush1.bf16.msra.mxu1 %v3589_v44 }
 0xbee   :  { %1255 = vmatprep.subr.bf16.mxu1 %v3592_v45 }
 0xbf1   :  { %1256 = vmatpush1.bf16.msra.mxu1 %v3595_v46 }
 0xbf2   :  { %1257 = vmatprep.subr.bf16.mxu1 %v3598_v47 }
 0xbf5   :  { %1258 = vmatpush1.bf16.msra.mxu1 %v3601_v51 }
 0xbf6   :  { %1364 = vmatprep.subr.bf16.mxu1 %v3604_v55 }
 0xc01   :  { %v1247_v58 = vpop.permute.xlu0 %1246 }
 0xc02   :  { %2586 = vmatmul.mubr.msk.bf16.vlgmr.msra.gmra.mrb[20].mxu1 %vm240_vm3, %v1247_v58 }
 0xc03   :  { %1365 = vmatpush1.bf16.msra.mxu1 %v3372_v56  ;;  %1396 = vmatprep.mubr.bf16.mxu1 %v3205_v0  ;;  %v3620_v56 = vld [vmem:[#allocation2 + $0x18] ss:$56 sps:$4 sm:$0xff]  }
 0xc04   :  { %1366 = vmatprep.subr.bf16.mxu1 %v3374_v57  ;;  %v3624_v57 = vld [vmem:[#allocation2 + $0x8c] ss:$56 sps:$4 sm:$0xff]  }
 0xc07   :  { %1367 = vmatpush1.bf16.msra.mxu1 %v3378_v59  ;;  %v3627_v59 = vld [vmem:[#allocation2 + $0x88] ss:$56 sps:$4 sm:$0xff]  }
 0xc08   :  { %1368 = vmatprep.subr.bf16.mxu1 %v3382_v60  ;;  %v3630_v60 = vld [vmem:[#allocation2 + $0xfc] ss:$56 sps:$4 sm:$0xff]  }
 0xc0b   :  { %1369 = vmatpush1.bf16.msra.mxu1 %v3385_v61  ;;  %v3633_v61 = vld [vmem:[#allocation2 + $0xf8] ss:$56 sps:$4 sm:$0xff]  }
 0xc0c   :  { %1370 = vmatprep.subr.bf16.mxu1 %v3388_v62  ;;  %v3636_v62 = vld [vmem:[#allocation2 + $0x16c] ss:$56 sps:$4 sm:$0xff]  }
 0xc0f   :  { %1371 = vmatpush1.bf16.msra.mxu1 %v3391_v63  ;;  %v3639_v63 = vld [vmem:[#allocation2 + $0x168] ss:$56 sps:$4 sm:$0xff]  }
 0xc10   :  { %1556 = vmatprep.subr.bf16.mxu1 %v3616_v3 }
 0xc12   :  { %2590 = vmatmul.mubr.msk.bf16.vlgmr.msra.gmra.mrb[24].mxu1 %vm240_vm3, %v1247_v58  ;;  %v1448_v58 = vrot.slane %v3575_v31, 7 }
 0xc13   :  { %1557 = vmatpush1.bf16.msra.mxu1 %v3620_v56  ;;  %1588 = vmatprep.mubr.bf16.mxu1 %v3205_v0 }
 0xc14   :  { %1558 = vmatprep.subr.bf16.mxu1 %v3624_v57 }
 0xc17   :  { %1559 = vmatpush1.bf16.msra.mxu1 %v3627_v59 }
 0xc18   :  { %1560 = vmatprep.subr.bf16.mxu1 %v3630_v60 }
 0xc1b   :  { %1561 = vmatpush1.bf16.msra.mxu1 %v3633_v61 }
 0xc1c   :  { %1562 = vmatprep.subr.bf16.mxu1 %v3636_v62 }
 0xc1f   :  { %1563 = vmatpush1.bf16.msra.mxu1 %v3639_v63 }
 0xc20   :  { %1717 = vmatprep.subr.bf16.mxu1 %v3642_v49 }
 0xcd5   :  { %v1285_v5 = vpop.f32.mrb[20].mxu1 }
 0xcd6   :  { %v1286_v52 = vadd.f32 %v1285_v5, %v3332_v7  ;;  %v1287_v8 = vpop.f32.mrb[21].mxu1 }
 0xcd7   :  { %v1289_v9 = vpop.f32.mrb[22].mxu1  ;;  %v1288_v11 = vadd.f32 %v1287_v8, %v3336_v16 }
 0xcd8   :  { %v2587_v4 = vmul.f32 -1.442695, %v1286_v52  ;;  %v1290_v50 = vpop.f32.mrb[23].mxu1 }
 0xcd9   :  { %v2588_v50 = vmul.f32 -1.442695, %v1288_v11 }
 0xcda   :  { %3010 = vpow2.f32 %v2587_v4 }
 0xcdb   :  { %3012 = vtanh.f32 %v1288_v11 }
 0xce4   :  { %v3011_v13 = vpop.eup %3010 }
 0xce5   :  { %v1297_v36 = vadd.f32 1.0, %v3011_v13  ;;  %v1398_v37 = vpop.f32.mrb[24].mxu1  ;;  %v3013_v33 = vpop.eup %3012 }
 0xce6   :  { %v1407_v38 = vrot.slane %v1398_v37, 3  ;;  %v1409_v39 = vrot.slane %v1398_v37, 4  ;;  %v1400_v40 = vpop.f32.mrb[25].mxu1 }
 0xce7   :  { %3014 = vrcp.f32 %v1297_v36  ;;  %v1402_v41 = vpop.f32.mrb[26].mxu1  ;;  %v1408_v32 = vrot.slane %v1400_v40, 3  ;;  %v1410_v35 = vrot.slane %v1400_v40, 4 }
 0xce8   :  { %v1415_v42 = vadd.f32 %v1407_v38, %v3264_v14  ;;  %v1417_v26 = vadd.f32 %v1409_v39, %v3266_v17  ;;  %v1403_v27 = vpop.f32.mrb[27].mxu1 }
 0xce9   :  { %v1416_v48 = vadd.f32 %v1408_v32, %v3276_v28  ;;  %v1418_v12 = vadd.f32 %v1410_v35, %v3273_v24 }
 0xcea   :  { %v2591_v29 = vmul.f32 -1.442695, %v1415_v42  ;;  %v2592_v30 = vmul.f32 -1.442695, %v1417_v26 }
 0xceb   :  { %v2593_v37 = vmul.f32 -1.442695, %v1416_v48  ;;  %v2594_v38 = vmul.f32 -1.442695, %v1418_v12 }
 0xcec   :  { %3016 = vpow2.f32 %v2591_v29 }
 0xced   :  { %3018 = vpow2.f32 %v2592_v30 }
 0xcee   :  { %3020 = vtanh.f32 %v1416_v48 }
 0xcef   :  { %3022 = vtanh.f32 %v1418_v12 }
 0xcf1   :  { %v3015_v34 = vpop.eup %3014 }
 0xcf2   :  { %v1308_v43 = vmul.f32 %v3015_v34, %v3013_v33  ;;  %v1307_v53 = vmul.f32 %v3015_v34, %v3569_v20 }
 0xcf4   :  { %1310 = vrot.lane.b32.xlu1 %v1308_v43, %s3206_s0 }
 0xcf6   :  { %v3017_v54 = vpop.eup %3016 }
 0xcf7   :  { %v3019_v19 = vpop.eup %3018  ;;  %v1425_v1 = vadd.f32 1.0, %v3017_v54 }
 0xcf8   :  { %v1426_v18 = vadd.f32 1.0, %v3019_v19  ;;  %v3021_v6 = vpop.eup %3020 }
 0xcf9   :  { %3024 = vrcp.f32 %v1425_v1  ;;  %v3023_v23 = vpop.eup %3022 }
 0xcfa   :  { %3026 = vrcp.f32 %v1426_v18 }
 0xcfb   :  { %3028 = vpow2.f32 %v2588_v50  ;;  %v3687_v50 = vld [vmem:[#allocation2 + $0x78] ss:$56 sps:$4 sm:$0xff]  }
 0xd03   :  { %v3025_v15 = vpop.eup %3024 }
 0xd04   :  { %v3027_v5 = vpop.eup %3026  ;;  %v1453_v52 = vmul.f32 %v3025_v15, %v3021_v6  ;;  %v1451_v8 = vmul.f32 %v3025_v15, %v1447_v25 }
 0xd05   :  { %v1454_v9 = vmul.f32 %v3027_v5, %v3023_v23  ;;  %v1452_v4 = vmul.f32 %v3027_v5, %v1448_v58  ;;  %v3029_v13 = vpop.eup %3028 }
 0xd06   :  { %1457 = vrot.lane.b32.xlu0 %v1453_v52, %s3206_s0  ;;  %v1304_v36 = vadd.f32 1.0, %v3029_v13  ;;  %v3690_v13 = vld [vmem:[#allocation2 + $0xec] ss:$56 sps:$4 sm:$0xff]  }
 0xd07   :  { %1459 = vrot.lane.b32.xlu1 %v1454_v9, %s3206_s0  ;;  %v3680_v9 = vld [vmem:[#allocation2 + $0x8] ss:$56 sps:$4 sm:$0xff]  }
 0xd08   :  { %3030 = vrcp.f32 %v1304_v36  ;;  %v3693_v36 = vld [vmem:[#allocation2 + $0xe8] ss:$56 sps:$4 sm:$0xff]  }
 0xd09   :  { %3032 = vpow2.f32 %v2593_v37  ;;  %v3696_v37 = vld [vmem:[#allocation2 + $0x15c] ss:$56 sps:$4 sm:$0xff]  }
 0xd0a   :  { %3034 = vpow2.f32 %v2594_v38  ;;  %v3699_v38 = vld [vmem:[#allocation2 + $0x158] ss:$56 sps:$4 sm:$0xff]  }
 0xd12   :  { %v3031_v40 = vpop.eup %3030 }
 0xd13   :  { %v3033_v41 = vpop.eup %3032 }
 0xd14   :  { %v3035_v42 = vpop.eup %3034  ;;  %v1439_v27 = vadd.f32 1.0, %v3033_v41 }
 0xd15   :  { %v1440_v29 = vadd.f32 1.0, %v3035_v42 }
 0xd66   :  { %v1311_v39 = vpop.permute.xlu1 %1310 }
 0xd67   :  { %v3657_v31 = vadd.f32 %v1311_v39, %v1307_v53 }
 0xd69   :  { %3036 = vtanh.f32 %v3657_v31 }
 0xd6a   :  { %3038 = vrcp.f32 %v1439_v27 }
 0xd6b   :  { %3040 = vrcp.f32 %v1440_v29 }
 0xd73   :  { %v3037_v26 = vpop.eup %3036 }
 0xd74   :  { %v1315_v11 = vmul.f32 %v3037_v26, %v3031_v40  ;;  %v3039_v34 = vpop.eup %3038 }
 0xd75   :  { %v3041_v43 = vpop.eup %3040 }
 0xd76   :  { %v1316_v30 = vpack.c.bf16 %v1315_v11, %v1315_v11 }
 0xd78   :  { %v1458_v32 = vpop.permute.xlu0 %1457  ;;  %1318 = vrot.lane.b32.xlu0 %v1316_v30, %s3206_s0 }
 0xd79   :  { %v3661_v20 = vadd.f32 %v1458_v32, %v1451_v8  ;;  %v1460_v33 = vpop.permute.xlu1 %1459 }
 0xd7a   :  { %v3663_v35 = vadd.f32 %v1460_v33, %v1452_v4  ;;  %v3684_v4 = vld [vmem:[#allocation2 + $0x7c] ss:$56 sps:$4 sm:$0xff]  }
 0xd7b   :  { %3042 = vtanh.f32 %v3661_v20 }
 0xd7c   :  { %3044 = vtanh.f32 %v3663_v35 }
 0xd85   :  { %v3043_v48 = vpop.eup %3042 }
 0xd86   :  { %v3045_v12 = vpop.eup %3044  ;;  %v1467_v54 = vmul.f32 %v3043_v48, %v3039_v34 }
 0xd87   :  { %v1468_v19 = vmul.f32 %v3045_v12, %v3041_v43 }
 0xd88   :  { %v1469_v1 = vpack.c.bf16 %v1467_v54, %v1467_v54 }
 0xd89   :  { %v1470_v18 = vpack.c.bf16 %v1468_v19, %v1468_v19 }
 0xd8a   :  { %v1473_v6 = vunpack.c.l.b16 %v1469_v1 }
 0xd8b   :  { %v1474_v23 = vunpack.c.l.b16 %v1470_v18 }
 0xd8c   :  { %v1475_v25 = vrot.slane %v1473_v6, 5 }
 0xd8d   :  { %v1476_v15 = vrot.slane %v1474_v23, 4 }
 0xd8f   :  { %v1477_v58 = vsel %vm195_vm2, %v1476_v15, %v1475_v25  ;;  %v1680_v15 = vrot.slane %v3661_v20, 7 }
 0xd90   :  { %v1478_v5 = vpack.c.b16 %v1477_v58, %v1477_v58 }
 0xd92   :  { %1479 = vrot.lane.b32.xlu1 %v1478_v5, %s3206_s0  ;;  %v1681_v5 = vrot.slane %v3663_v35, 7 }
 0xdea   :  { %v1319_v52 = vpop.permute.xlu0 %1318 }
 0xdeb   :  { %2589 = vmatmul.mubr.msk.bf16.vlgmr.msra.gmra.mrb[20].mxu0 %vm240_vm3, %v1319_v52 }
 0xdec   :  { %1485 = vmatpush1.bf16.msra.mxu0 %v3582_v2  ;;  %1516 = vmatprep.mubr.bf16.mxu0 %v3205_v0 }
 0xded   :  { %1486 = vmatprep.subr.bf16.mxu0 %v3586_v22 }
 0xdf0   :  { %1487 = vmatpush1.bf16.msra.mxu0 %v3589_v44 }
 0xdf1   :  { %1488 = vmatprep.subr.bf16.mxu0 %v3592_v45 }
 0xdf4   :  { %1489 = vmatpush1.bf16.msra.mxu0 %v3595_v46 }
 0xdf5   :  { %1490 = vmatprep.subr.bf16.mxu0 %v3598_v47 }
 0xdf8   :  { %1491 = vmatpush1.bf16.msra.mxu0 %v3601_v51 }
 0xdf9   :  { %1597 = vmatprep.subr.bf16.mxu0 %v3604_v55 }
 0xe04   :  { %v1480_v8 = vpop.permute.xlu1 %1479 }
 0xe05   :  { %2595 = vmatmul.mubr.msk.bf16.vlgmr.msra.gmra.mrb[20].mxu0 %vm240_vm3, %v1480_v8 }
 0xe06   :  { %1598 = vmatpush1.bf16.msra.mxu0 %v3680_v9  ;;  %1629 = vmatprep.mubr.bf16.mxu0 %v3205_v0 }
 0xe07   :  { %1599 = vmatprep.subr.bf16.mxu0 %v3684_v4 }
 0xe0a   :  { %1600 = vmatpush1.bf16.msra.mxu0 %v3687_v50 }
 0xe0b   :  { %1601 = vmatprep.subr.bf16.mxu0 %v3690_v13 }
 0xe0e   :  { %1602 = vmatpush1.bf16.msra.mxu0 %v3693_v36 }
 0xe0f   :  { %1603 = vmatprep.subr.bf16.mxu0 %v3696_v37 }
 0xe12   :  { %1604 = vmatpush1.bf16.msra.mxu0 %v3699_v38 }
 0xe13   :  { %1789 = vmatprep.subr.bf16.mxu0 %v3616_v3 }
 0xe15   :  { %2599 = vmatmul.mubr.msk.bf16.vlgmr.msra.gmra.mrb[24].mxu0 %vm240_vm3, %v1480_v8 }
 0xe16   :  { %1790 = vmatpush1.bf16.msra.mxu0 %v3620_v56  ;;  %1821 = vmatprep.mubr.bf16.mxu0 %v3205_v0 }
 0xe17   :  { %1791 = vmatprep.subr.bf16.mxu0 %v3624_v57 }
 0xe1a   :  { %1792 = vmatpush1.bf16.msra.mxu0 %v3627_v59 }
 0xe1b   :  { %1793 = vmatprep.subr.bf16.mxu0 %v3630_v60 }
 0xe1e   :  { %1794 = vmatpush1.bf16.msra.mxu0 %v3633_v61 }
 0xe1f   :  { %1795 = vmatprep.subr.bf16.mxu0 %v3636_v62 }
 0xe22   :  { %1796 = vmatpush1.bf16.msra.mxu0 %v3639_v63 }
 0xe23   :  { %1950 = vmatprep.subr.bf16.mxu0 %v3642_v49 }
 0xed8   :  { %v1518_v3 = vpop.f32.mrb[20].mxu0 }
 0xed9   :  { %v1519_v53 = vadd.f32 %v1518_v3, %v3332_v7  ;;  %v1520_v56 = vpop.f32.mrb[21].mxu0 }
 0xeda   :  { %v1522_v39 = vpop.f32.mrb[22].mxu0  ;;  %v1521_v57 = vadd.f32 %v1520_v56, %v3336_v16 }
 0xedb   :  { %v2596_v40 = vmul.f32 -1.442695, %v1519_v53  ;;  %v1523_v41 = vpop.f32.mrb[23].mxu0 }
 0xedc   :  { %v2597_v39 = vmul.f32 -1.442695, %v1521_v57 }
 0xedd   :  { %3046 = vpow2.f32 %v2596_v40 }
 0xede   :  { %3048 = vtanh.f32 %v1521_v57 }
 0xee7   :  { %v3047_v59 = vpop.eup %3046 }
 0xee8   :  { %v1530_v60 = vadd.f32 1.0, %v3047_v59  ;;  %v1631_v42 = vpop.f32.mrb[24].mxu0  ;;  %v3049_v33 = vpop.eup %3048 }
 0xee9   :  { %v1640_v61 = vrot.slane %v1631_v42, 2  ;;  %v1642_v62 = vrot.slane %v1631_v42, 3  ;;  %v1633_v26 = vpop.f32.mrb[25].mxu0 }
 0xeea   :  { %3050 = vrcp.f32 %v1530_v60  ;;  %v1635_v63 = vpop.f32.mrb[26].mxu0  ;;  %v1641_v32 = vrot.slane %v1633_v26, 2  ;;  %v1643_v34 = vrot.slane %v1633_v26, 3 }
 0xeeb   :  { %v1648_v49 = vadd.f32 %v1640_v61, %v3264_v14  ;;  %v1650_v11 = vadd.f32 %v1642_v62, %v3266_v17  ;;  %v1636_v27 = vpop.f32.mrb[27].mxu0 }
 0xeec   :  { %v1649_v12 = vadd.f32 %v1641_v32, %v3276_v28  ;;  %v1651_v54 = vadd.f32 %v1643_v34, %v3273_v24 }
 0xeed   :  { %v2600_v29 = vmul.f32 -1.442695, %v1648_v49  ;;  %v2601_v30 = vmul.f32 -1.442695, %v1650_v11 }
 0xeee   :  { %v2602_v59 = vmul.f32 -1.442695, %v1649_v12  ;;  %v2603_v60 = vmul.f32 -1.442695, %v1651_v54 }
 0xeef   :  { %3052 = vpow2.f32 %v2600_v29 }
 0xef0   :  { %3054 = vpow2.f32 %v2601_v30 }
 0xef1   :  { %3056 = vtanh.f32 %v1649_v12 }
 0xef2   :  { %3058 = vtanh.f32 %v1651_v54 }
 0xef4   :  { %v3051_v43 = vpop.eup %3050 }
 0xef5   :  { %v1541_v48 = vmul.f32 %v3051_v43, %v3049_v33  ;;  %v1540_v20 = vmul.f32 %v3051_v43, %v3657_v31 }
 0xef7   :  { %1543 = vrot.lane.b32.xlu0 %v1541_v48, %s3206_s0 }
 0xef9   :  { %v3053_v19 = vpop.eup %3052 }
 0xefa   :  { %v3055_v1 = vpop.eup %3054  ;;  %v1658_v18 = vadd.f32 1.0, %v3053_v19 }
 0xefb   :  { %v1659_v6 = vadd.f32 1.0, %v3055_v1  ;;  %v3057_v23 = vpop.eup %3056 }
 0xefc   :  { %3060 = vrcp.f32 %v1658_v18  ;;  %v3059_v25 = vpop.eup %3058 }
 0xefd   :  { %3062 = vrcp.f32 %v1659_v6 }
 0xefe   :  { %3064 = vpow2.f32 %v2597_v39 }
 0xf06   :  { %v3061_v58 = vpop.eup %3060 }
 0xf07   :  { %v3063_v52 = vpop.eup %3062  ;;  %v1686_v8 = vmul.f32 %v3061_v58, %v3057_v23  ;;  %v1684_v3 = vmul.f32 %v3061_v58, %v1680_v15 }
 0xf08   :  { %v1687_v53 = vmul.f32 %v3063_v52, %v3059_v25  ;;  %v1685_v56 = vmul.f32 %v3063_v52, %v1681_v5  ;;  %v3065_v40 = vpop.eup %3064 }
 0xf09   :  { %1690 = vrot.lane.b32.xlu1 %v1686_v8, %s3206_s0  ;;  %v1537_v41 = vadd.f32 1.0, %v3065_v40 }
 0xf0a   :  { %1692 = vrot.lane.b32.xlu0 %v1687_v53, %s3206_s0 }
 0xf0b   :  { %3066 = vrcp.f32 %v1537_v41 }
 0xf0c   :  { %3068 = vpow2.f32 %v2602_v59 }
 0xf0d   :  { %3070 = vpow2.f32 %v2603_v60 }
 0xf15   :  { %v3067_v61 = vpop.eup %3066 }
 0xf16   :  { %v3069_v62 = vpop.eup %3068 }
 0xf17   :  { %v3071_v26 = vpop.eup %3070  ;;  %v1672_v49 = vadd.f32 1.0, %v3069_v62 }
 0xf18   :  { %v1673_v11 = vadd.f32 1.0, %v3071_v26 }
 0xf69   :  { %v1544_v42 = vpop.permute.xlu0 %1543 }
 0xf6a   :  { %v3725_v35 = vadd.f32 %v1544_v42, %v1540_v20 }
 0xf6c   :  { %3072 = vtanh.f32 %v3725_v35 }
 0xf6d   :  { %3074 = vrcp.f32 %v1672_v49 }
 0xf6e   :  { %3076 = vrcp.f32 %v1673_v11 }
 0xf76   :  { %v3073_v63 = vpop.eup %3072 }
 0xf77   :  { %v1548_v57 = vmul.f32 %v3073_v63, %v3067_v61  ;;  %v3075_v33 = vpop.eup %3074 }
 0xf78   :  { %v3077_v34 = vpop.eup %3076 }
 0xf79   :  { %v1549_v27 = vpack.c.bf16 %v1548_v57, %v1548_v57 }
 0xf7b   :  { %v1691_v29 = vpop.permute.xlu1 %1690  ;;  %1551 = vrot.lane.b32.xlu1 %v1549_v27, %s3206_s0 }
 0xf7c   :  { %v3729_v31 = vadd.f32 %v1691_v29, %v1684_v3  ;;  %v1693_v30 = vpop.permute.xlu0 %1692 }
 0xf7d   :  { %v3731_v32 = vadd.f32 %v1693_v30, %v1685_v56 }
 0xf7e   :  { %3078 = vtanh.f32 %v3729_v31 }
 0xf7f   :  { %3080 = vtanh.f32 %v3731_v32 }
 0xf88   :  { %v3079_v43 = vpop.eup %3078 }
 0xf89   :  { %v3081_v48 = vpop.eup %3080  ;;  %v1700_v12 = vmul.f32 %v3079_v43, %v3075_v33 }
 0xf8a   :  { %v1701_v54 = vmul.f32 %v3081_v48, %v3077_v34  ;;  %v1913_v34 = vrot.slane %v3729_v31, 7  ;;  %v1914_v48 = vrot.slane %v3731_v32, 7  ;;  %v2023_v32 = vld [vmem:[%s3854_s1] sm:$0x3] }
 0xf8b   :  { %v1702_v19 = vpack.c.bf16 %v1700_v12, %v1700_v12 }
 0xf8c   :  { %v1703_v1 = vpack.c.bf16 %v1701_v54, %v1701_v54 }
 0xf8d   :  { %v1706_v18 = vunpack.c.l.b16 %v1702_v19 }
 0xf8e   :  { %v1707_v6 = vunpack.c.l.b16 %v1703_v1  ;;  %v2809_v1 = vld [vmem:[#allocation2 + $0x20] ss:$56 sps:$4 sm:$0x3f]  }
 0xf8f   :  { %v1708_v23 = vrot.slane %v1706_v18, 6  ;;  %v3207_v18 = vmov 0.0  }
 0xf90   :  { %v1709_v25 = vrot.slane %v1707_v6, 5  ;;  %v3208_v6 = vmov 65535  }
 0xf91   :  { %v2042_v31 = vsel %vm2040_vm4, 4294967295, %v3208_v6 }
 0xf92   :  { %v1710_v15 = vsel %vm195_vm2, %v1709_v25, %v1708_v23  ;;  %v2043_v23 = vsel %vm2041_vm5, %v2042_v31, 0 }
 0xf93   :  { %v1711_v58 = vpack.c.b16 %v1710_v15, %v1710_v15  ;;  %v2045_v25 = vand.u32 %v2809_v1, %v2043_v23  ;;  %v2024_v15 = vpack.c.bf16 %v2023_v32, %v2023_v32 }
 0xf95   :  { %1712 = vrot.lane.b32.xlu0 %v1711_v58, %s3206_s0 }
 0xfed   :  { %v1552_v5 = vpop.permute.xlu1 %1551 }
 0xfee   :  { %2598 = vmatmul.mubr.msk.bf16.vlgmr.msra.gmra.mrb[28].mxu1 %vm240_vm3, %v1552_v5 }
 0xfef   :  { %1718 = vmatpush1.bf16.msra.mxu1 %v3582_v2  ;;  %1749 = vmatprep.mubr.bf16.mxu1 %v3205_v0 }
 0xff0   :  { %1719 = vmatprep.subr.bf16.mxu1 %v3586_v22 }
 0xff3   :  { %1720 = vmatpush1.bf16.msra.mxu1 %v3589_v44 }
 0xff4   :  { %1721 = vmatprep.subr.bf16.mxu1 %v3592_v45 }
 0xff7   :  { %1722 = vmatpush1.bf16.msra.mxu1 %v3595_v46 }
 0xff8   :  { %1723 = vmatprep.subr.bf16.mxu1 %v3598_v47 }
 0xffb   :  { %1724 = vmatpush1.bf16.msra.mxu1 %v3601_v51 }
 0xffc   :  { %1830 = vmatprep.subr.bf16.mxu1 %v3604_v55 }
0x1007   :  { %v1713_v52 = vpop.permute.xlu0 %1712 }
0x1008   :  { %2604 = vmatmul.mubr.msk.bf16.vlgmr.msra.gmra.mrb[28].mxu1 %vm240_vm3, %v1713_v52 }
0x1009   :  { %1831 = vmatpush1.bf16.msra.mxu1 %v3680_v9  ;;  %1862 = vmatprep.mubr.bf16.mxu1 %v3205_v0 }
0x100a   :  { %1832 = vmatprep.subr.bf16.mxu1 %v3684_v4 }
0x100d   :  { %1833 = vmatpush1.bf16.msra.mxu1 %v3687_v50 }
0x100e   :  { %1834 = vmatprep.subr.bf16.mxu1 %v3690_v13 }
0x1011   :  { %1835 = vmatpush1.bf16.msra.mxu1 %v3693_v36 }
0x1012   :  { %1836 = vmatprep.subr.bf16.mxu1 %v3696_v37 }
0x1015   :  { %1837 = vmatpush1.bf16.msra.mxu1 %v3699_v38 }
0x1016   :  { %2670 = vmatprep.subr.bf16.mxu1 %v3207_v18 }
0x1018   :  { %2608 = vmatmul.mubr.msk.bf16.vlgmr.msra.gmra.mrb[32].mxu1 %vm240_vm3, %v1713_v52 }
0x1019   :  { %2672 = vmatprep.mubr.msk.bf16.mxu1 %vm3209_vm6, %v3207_v18  ;;  %2671 = vmatpush3.bf16.msra.mxu1 %v2045_v25 }
0x1020   :  { %2673 = vmatmul.mubr.msk.bf16.vlgmr.msra.gmra.mrb[36].mxu1 %vm2036_vm7, %v2024_v15 }
0x1021   :  { %2282 = vmatprep.mubr.bf16.mxu1 %v3205_v0 }
0x10db   :  { %v1751_v55 = vpop.f32.mrb[28].mxu1 }
0x10dc   :  { %v1752_v8 = vadd.f32 %v1751_v55, %v3332_v7  ;;  %v1753_v9 = vpop.f32.mrb[29].mxu1 }
0x10dd   :  { %v1755_v3 = vpop.f32.mrb[30].mxu1  ;;  %v1754_v4 = vadd.f32 %v1753_v9, %v3336_v16 }
0x10de   :  { %v2605_v53 = vmul.f32 -1.442695, %v1752_v8  ;;  %v1756_v56 = vpop.f32.mrb[31].mxu1 }
0x10df   :  { %v2606_v58 = vmul.f32 -1.442695, %v1754_v4 }
0x10e0   :  { %3082 = vpow2.f32 %v2605_v53 }
0x10e1   :  { %3084 = vtanh.f32 %v1754_v4 }
0x10ea   :  { %v3083_v50 = vpop.eup %3082 }
0x10eb   :  { %v1763_v13 = vadd.f32 1.0, %v3083_v50  ;;  %v1864_v39 = vpop.f32.mrb[32].mxu1  ;;  %v3085_v62 = vpop.eup %3084 }
0x10ec   :  { %v1873_v36 = vrot.slane %v1864_v39, 1  ;;  %v1875_v37 = vrot.slane %v1864_v39, 2  ;;  %v1866_v40 = vpop.f32.mrb[33].mxu1 }
0x10ed   :  { %3086 = vrcp.f32 %v1763_v13  ;;  %v1868_v38 = vpop.f32.mrb[34].mxu1  ;;  %v1874_v61 = vrot.slane %v1866_v40, 1  ;;  %v1876_v26 = vrot.slane %v1866_v40, 2 }
0x10ee   :  { %v1881_v41 = vadd.f32 %v1873_v36, %v3264_v14  ;;  %v1883_v59 = vadd.f32 %v1875_v37, %v3266_v17  ;;  %v1869_v60 = vpop.f32.mrb[35].mxu1 }
0x10ef   :  { %v1882_v49 = vadd.f32 %v1874_v61, %v3276_v28  ;;  %v1884_v11 = vadd.f32 %v1876_v26, %v3273_v24 }
0x10f0   :  { %v2609_v20 = vmul.f32 -1.442695, %v1881_v41  ;;  %v2610_v42 = vmul.f32 -1.442695, %v1883_v59 }
0x10f1   :  { %v2611_v55 = vmul.f32 -1.442695, %v1882_v49  ;;  %v2612_v8 = vmul.f32 -1.442695, %v1884_v11 }
0x10f2   :  { %3088 = vpow2.f32 %v2609_v20 }
0x10f3   :  { %3090 = vpow2.f32 %v2610_v42 }
0x10f4   :  { %3092 = vtanh.f32 %v1882_v49 }
0x10f5   :  { %3094 = vtanh.f32 %v1884_v11 }
0x10f7   :  { %v3087_v63 = vpop.eup %3086 }
0x10f8   :  { %v1774_v57 = vmul.f32 %v3087_v63, %v3085_v62  ;;  %v1773_v9 = vmul.f32 %v3087_v63, %v3725_v35 }
0x10fa   :  { %1776 = vrot.lane.b32.xlu1 %v1774_v57, %s3206_s0 }
0x10fc   :  { %v3089_v27 = vpop.eup %3088 }
0x10fd   :  { %v3091_v14 = vpop.eup %3090  ;;  %v1891_v29 = vadd.f32 1.0, %v3089_v27 }
0x10fe   :  { %v1892_v17 = vadd.f32 1.0, %v3091_v14  ;;  %v3093_v30 = vpop.eup %3092 }
0x10ff   :  { %3096 = vrcp.f32 %v1891_v29  ;;  %v3095_v33 = vpop.eup %3094 }
0x1100   :  { %3098 = vrcp.f32 %v1892_v17 }
0x1101   :  { %3100 = vpow2.f32 %v2606_v58 }
0x1109   :  { %v3097_v43 = vpop.eup %3096 }
0x110a   :  { %v3099_v28 = vpop.eup %3098  ;;  %v1919_v12 = vmul.f32 %v3097_v43, %v3093_v30  ;;  %v1917_v24 = vmul.f32 %v3097_v43, %v1913_v34 }
0x110b   :  { %v1920_v54 = vmul.f32 %v3099_v28, %v3095_v33  ;;  %v1918_v19 = vmul.f32 %v3099_v28, %v1914_v48  ;;  %v3101_v5 = vpop.eup %3100  ;;  %v2081_v33 = vpop.f32.mrb[36].mxu1 }
0x110c   :  { %1923 = vrot.lane.b32.xlu0 %v1919_v12, %s3206_s0  ;;  %v1770_v52 = vadd.f32 1.0, %v3101_v5  ;;  %v2674_v34 = vpop.f32.mrb[37].mxu1 }
0x110d   :  { %1925 = vrot.lane.b32.xlu1 %v1920_v54, %s3206_s0  ;;  %v2084_v43 = vpop.f32.mrb[38].mxu1 }
0x110e   :  { %3102 = vrcp.f32 %v1770_v52  ;;  %v2675_v48 = vpop.f32.mrb[39].mxu1 }
0x110f   :  { %3104 = vpow2.f32 %v2611_v55  ;;  %v2814_v55 = vld [vmem:[#allocation2 + $0x2c] ss:$56 sps:$4 sm:$0xff]  }
0x1110   :  { %3106 = vpow2.f32 %v2612_v8  ;;  %v2817_v8 = vld [vmem:[#allocation2 + $0x9c] ss:$56 sps:$4 sm:$0xff]   ;;  %2250 = vmatprep.subr.bf16.mxu1 %v2814_v55 }
0x1118   :  { %v3103_v56 = vpop.eup %3102 }
0x1119   :  { %v3105_v50 = vpop.eup %3104 }
0x111a   :  { %v3107_v13 = vpop.eup %3106  ;;  %v1905_v36 = vadd.f32 1.0, %v3105_v50  ;;  %v2821_v50 = vld [vmem:[#allocation2 + $0x178] ss:$56 sps:$4 sm:$0xff]  }
0x111b   :  { %v1906_v37 = vadd.f32 1.0, %v3107_v13  ;;  %v2826_v13 = vld [vmem:[#allocation2 + $0x1ec] ss:$56 sps:$4 sm:$0xff]  }
0x116c   :  { %v1777_v3 = vpop.permute.xlu1 %1776 }
0x116d   :  { %v3776_v53 = vadd.f32 %v1777_v3, %v1773_v9  ;;  %v2815_v9 = vld [vmem:[#allocation2 + $0x98] ss:$56 sps:$4 sm:$0xff]   ;;  %v2818_v3 = vld [vmem:[#allocation2 + $0x108] ss:$56 sps:$4 sm:$0xff]  }
0x116f   :  { %3108 = vtanh.f32 %v3776_v53 }
0x1170   :  { %3110 = vrcp.f32 %v1905_v36 }
0x1171   :  { %3112 = vrcp.f32 %v1906_v37 }
0x1179   :  { %v3109_v39 = vpop.eup %3108 }
0x117a   :  { %v1781_v4 = vmul.f32 %v3109_v39, %v3103_v56  ;;  %v3111_v60 = vpop.eup %3110  ;;  %v2823_v56 = vld [vmem:[#allocation2 + $0x17c] ss:$56 sps:$4 sm:$0xff]   ;;  %v2824_v39 = vld [vmem:[#allocation2 + $0x1e8] ss:$56 sps:$4 sm:$0xff]  }
0x117b   :  { %v3113_v20 = vpop.eup %3112 }
0x117c   :  { %v1782_v40 = vpack.c.bf16 %v1781_v4, %v1781_v4 }
0x117e   :  { %v1924_v38 = vpop.permute.xlu0 %1923  ;;  %1784 = vrot.lane.b32.xlu0 %v1782_v40, %s3206_s0 }
0x117f   :  { %v1929_v35 = vadd.f32 %v1924_v38, %v1917_v24  ;;  %v1926_v41 = vpop.permute.xlu1 %1925 }
0x1180   :  { %v1930_v59 = vadd.f32 %v1926_v41, %v1918_v19  ;;  %v2619_v41 = vld [vmem:[%s3856_s3 + $0x5] ss:$0 sm:$0xff] }
0x1181   :  { %3114 = vtanh.f32 %v1929_v35 }
0x1182   :  { %3116 = vtanh.f32 %v1930_v59  ;;  %v2829_v59 = vld [vmem:[#allocation2 + $0x25c] ss:$56 sps:$4 sm:$0xff]  }
0x118b   :  { %v3115_v42 = vpop.eup %3114 }
0x118c   :  { %v3117_v61 = vpop.eup %3116  ;;  %v1933_v62 = vmul.f32 %v3115_v42, %v3111_v60  ;;  %v2827_v60 = vld [vmem:[#allocation2 + $0x258] ss:$56 sps:$4 sm:$0xff]  }
0x118d   :  { %v1934_v26 = vmul.f32 %v3117_v61, %v3113_v20 }
0x118e   :  { %v1935_v63 = vpack.c.bf16 %v1933_v62, %v1933_v62 }
0x118f   :  { %v1936_v57 = vpack.c.bf16 %v1934_v26, %v1934_v26 }
0x1190   :  { %v1939_v49 = vunpack.c.l.b16 %v1935_v63 }
0x1191   :  { %v1940_v11 = vunpack.c.l.b16 %v1936_v57 }
0x1192   :  { %v1941_v27 = vrot.slane %v1939_v49, 7 }
0x1193   :  { %v1942_v14 = vrot.slane %v1940_v11, 6 }
0x1195   :  { %v1943_v29 = vsel %vm195_vm2, %v1942_v14, %v1941_v27  ;;  %v2830_v14 = vld [vmem:[#allocation2 + $0x30] ss:$56 sps:$4 sm:$0xff]  }
0x1196   :  { %v1944_v17 = vpack.c.b16 %v1943_v29, %v1943_v29  ;;  %v2831_v29 = vld [vmem:[#allocation2 + $0xa0] ss:$56 sps:$4 sm:$0xff]  }
0x1198   :  { %1945 = vrot.lane.b32.xlu1 %v1944_v17, %s3206_s0  ;;  %v2832_v17 = vld [vmem:[#allocation2 + $0x110] ss:$56 sps:$4 sm:$0xff]  }
0x11f0   :  { %v1785_v30 = vpop.permute.xlu0 %1784 }
0x11f1   :  { %2607 = vmatmul.mubr.msk.bf16.vlgmr.msra.gmra.mrb[28].mxu0 %vm240_vm3, %v1785_v30  ;;  %v2833_v30 = vld [vmem:[#allocation2 + $0x180] ss:$56 sps:$4 sm:$0xff]  }
0x11f2   :  { %1951 = vmatpush1.bf16.msra.mxu0 %v3582_v2  ;;  %1982 = vmatprep.mubr.bf16.mxu0 %v3205_v0  ;;  %v2616_v0 = vld [vmem:[%s3856_s3 + $0x4] ss:$0 sm:$0xff] }
0x11f3   :  { %1952 = vmatprep.subr.bf16.mxu0 %v3586_v22  ;;  %v2082_v2 = vadd.f32 %v2616_v0, %v2081_v33  ;;  %v2810_v22 = vld [vmem:[#allocation2 + $0x24] ss:$56 sps:$4 sm:$0xff]  }
0x11f4   :  { %v2174_v33 = vld [vmem:[%s3856_s3 + $0x6] sm:$0x3] }
0x11f5   :  { %v2179_v34 = vrot.slane %v2174_v33, %v3258_v10  ;;  %v2183_v0 = vrot.slane %v2174_v33, %v3270_v21  ;;  %v2834_v10 = vld [vmem:[#allocation2 + $0x34] ss:$56 sps:$4 sm:$0xff]   ;;  %v2835_v21 = vld [vmem:[#allocation2 + $0xa4] ss:$56 sps:$4 sm:$0xff]  }
0x11f6   :  { %1953 = vmatpush1.bf16.msra.mxu0 %v3589_v44  ;;  %v2087_v44 = vmax.f32 %v2082_v2, 0.0 }
0x11f7   :  { %1954 = vmatprep.subr.bf16.mxu0 %v3592_v45  ;;  %v2811_v45 = vld [vmem:[#allocation2 + $0x94] ss:$56 sps:$4 sm:$0xff]  }
0x11fa   :  { %1955 = vmatpush1.bf16.msra.mxu0 %v3595_v46  ;;  %v2088_v46 = vpack.c.bf16 %v2087_v44, %v2087_v44 }
0x11fb   :  { %1956 = vmatprep.subr.bf16.mxu0 %v3598_v47 }
0x11fe   :  { %1957 = vmatpush1.bf16.msra.mxu0 %v3601_v51 }
0x11ff   :  { %2676 = vmatprep.subr.bf16.mxu0 %v3207_v18 }
0x120a   :  { %v1946_v28 = vpop.permute.xlu1 %1945 }
0x120b   :  { %2613 = vmatmul.mubr.msk.bf16.vlgmr.msra.gmra.mrb[28].mxu0 %vm240_vm3, %v1946_v28 }
0x120c   :  { %2677 = vmatpush3.bf16.msra.mxu0 %v2810_v22  ;;  %2680 = vmatprep.mubr.msk.bf16.mxu0 %vm3209_vm6, %v3207_v18 }
0x120d   :  { %2678 = vmatprep.subr.bf16.mxu0 %v3207_v18 }
0x1210   :  { %2679 = vmatpush3.bf16.msra.mxu0 %v2811_v45 }
0x1211   :  { %2684 = vmatprep.subr.bf16.mxu0 %v3207_v18 }
0x1213   :  { %2681 = vmatmul.mubr.msk.bf16.vlgmr.msra.gmra.mrb[32].mxu0 %vm2107_vm8, %v2088_v46 }
0x1214   :  { %2692 = vmatprep.mubr.msk.bf16.mxu0 %vm3209_vm6, %v3207_v18  ;;  %2685 = vmatpush3.bf16.msra.mxu0 %v2830_v14 }
0x1215   :  { %2686 = vmatprep.subr.bf16.mxu0 %v3207_v18 }
0x1218   :  { %2687 = vmatpush3.bf16.msra.mxu0 %v2831_v29 }
0x1219   :  { %2688 = vmatprep.subr.bf16.mxu0 %v3207_v18 }
0x121c   :  { %2689 = vmatpush3.bf16.msra.mxu0 %v2832_v17 }
0x121d   :  { %2690 = vmatprep.subr.bf16.mxu0 %v3207_v18 }
0x1220   :  { %2691 = vmatpush3.bf16.msra.mxu0 %v2833_v30 }
0x1221   :  { %2696 = vmatprep.subr.bf16.mxu0 %v3207_v18 }
0x12de   :  { %v1984_v47 = vpop.f32.mrb[28].mxu0 }
0x12df   :  { %v1985_v51 = vadd.f32 %v1984_v47, %v3332_v7  ;;  %v1986_v12 = vpop.f32.mrb[29].mxu0  ;;  %v2812_v7 = vld [vmem:[#allocation2 + $0x28] ss:$56 sps:$4 sm:$0xff]  }
0x12e0   :  { %v1988_v24 = vpop.f32.mrb[30].mxu0  ;;  %v1987_v1 = vadd.f32 %v1986_v12, %v3336_v16  ;;  %2251 = vmatpush1.bf16.msra.mxu1 %v2812_v7  ;;  %v2820_v16 = vld [vmem:[#allocation2 + $0x10c] ss:$56 sps:$4 sm:$0xff]  }
0x12e1   :  { %v2614_v54 = vmul.f32 -1.442695, %v1985_v51  ;;  %v1989_v19 = vpop.f32.mrb[31].mxu0  ;;  %2252 = vmatprep.subr.bf16.mxu1 %v2817_v8  ;;  %v2836_v12 = vld [vmem:[#allocation2 + $0x114] ss:$56 sps:$4 sm:$0xff]  }
0x12e2   :  { %v2615_v4 = vmul.f32 -1.442695, %v1987_v1  ;;  %v2837_v24 = vld [vmem:[#allocation2 + $0x184] ss:$56 sps:$4 sm:$0xff]  }
0x12e3   :  { %3118 = vpow2.f32 %v2614_v54  ;;  %v2838_v54 = vld [vmem:[#allocation2 + $0x1f4] ss:$56 sps:$4 sm:$0xff]   ;;  %v2839_v19 = vld [vmem:[#allocation2 + $0x264] ss:$56 sps:$4 sm:$0xff]  }
0x12e4   :  { %3120 = vtanh.f32 %v1987_v1  ;;  %2253 = vmatpush1.bf16.msra.mxu1 %v2815_v9  ;;  %v2840_v1 = vld [vmem:[#allocation2 + $0x2d4] ss:$56 sps:$4 sm:$0xff]   ;;  %v2642_v9 = vld [vmem:[%s3856_s3 + $0x9] ss:$0 sm:$0xff] }
0x12e5   :  { %2254 = vmatprep.subr.bf16.mxu1 %v2820_v16 }
0x12e6   :  { %v2145_v23 = vpop.f32.mrb[32].mxu0 }
0x12e7   :  { %v2682_v15 = vpop.f32.mrb[33].mxu0  ;;  %v2146_v20 = vadd.f32 %v2619_v41, %v2145_v23 }
0x12e8   :  { %v2148_v5 = vpop.f32.mrb[34].mxu0  ;;  %2255 = vmatpush1.bf16.msra.mxu1 %v2818_v3 }
0x12e9   :  { %v2683_v52 = vpop.f32.mrb[35].mxu0  ;;  %2256 = vmatprep.subr.bf16.mxu1 %v2823_v56  ;;  %v2151_v61 = vmax.f32 %v2146_v20, 0.0 }
0x12ec   :  { %2257 = vmatpush1.bf16.msra.mxu1 %v2821_v50 }
0x12ed   :  { %v3119_v6 = vpop.eup %3118  ;;  %2258 = vmatprep.subr.bf16.mxu1 %v2826_v13 }
0x12ee   :  { %v1996_v31 = vadd.f32 1.0, %v3119_v6  ;;  %v3121_v32 = vpop.eup %3120  ;;  %v2841_v6 = vld [vmem:[#allocation2 + $0x344] ss:$56 sps:$4 sm:$0xff]  }
0x12f0   :  { %3122 = vrcp.f32 %v1996_v31  ;;  %2259 = vmatpush1.bf16.msra.mxu1 %v2824_v39  ;;  %v2636_v31 = vld [vmem:[%s3856_s3 + $0x8] ss:$0 sm:$0xff] }
0x12f1   :  { %3124 = vpow2.f32 %v2615_v4  ;;  %2260 = vmatprep.subr.bf16.mxu1 %v2829_v59 }
0x12f4   :  { %2261 = vmatpush1.bf16.msra.mxu1 %v2827_v60 }
0x12fa   :  { %v3123_v25 = vpop.eup %3122 }
0x12fb   :  { %v2007_v58 = vmul.f32 %v3123_v25, %v3121_v32  ;;  %v3125_v36 = vpop.eup %3124  ;;  %v2006_v40 = vmul.f32 %v3123_v25, %v3776_v53 }
0x12fc   :  { %v2003_v37 = vadd.f32 1.0, %v3125_v36 }
0x12fd   :  { %2009 = vrot.lane.b32.xlu0 %v2007_v58, %s3206_s0 }
0x12fe   :  { %3126 = vrcp.f32 %v2003_v37 }
0x1308   :  { %v3127_v42 = vpop.eup %3126 }
0x136f   :  { %v2010_v38 = vpop.permute.xlu0 %2009 }
0x1370   :  { %v2012_v35 = vadd.f32 %v2010_v38, %v2006_v40 }
0x1372   :  { %3128 = vtanh.f32 %v2012_v35 }
0x137c   :  { %v3129_v62 = vpop.eup %3128 }
0x137d   :  { %v2014_v26 = vmul.f32 %v3129_v62, %v3127_v42 }
0x137f   :  { %v2766_v63 = vpack.i.bf16 %v2151_v61, %v2014_v26 }
0x1381   :  { %2767 = vrot.lane.b32.xlu1 %v2766_v63, %s3206_s0 }
0x13f3   :  { %v2768_v53 = vpop.permute.xlu1 %2767 }
0x13f4   :  { %v2770_v57 = vunpack.i.h.bf16 %v2768_v53  ;;  %v2769_v49 = vunpack.i.l.bf16 %v2768_v53 }
0x13f6   :  { %v2160_v11 = vsel %vm240_vm3, %v2769_v49, %v2770_v57 }
0x13f7   :  { %v2161_v27 = vpack.c.bf16 %v2160_v11, %v2160_v11 }
0x13f9   :  { %2635 = vmatmul.mubr.msk.bf16.vlgmr.msra.gmra.mrb[40].mxu1 %vm2246_vm9, %v2161_v27 }
0x14cc   :  { %v2284_v43 = vpop.f32.mrb[40].mxu1 }
0x14cd   :  { %v2285_v48 = vadd.f32 %v2284_v43, %v2179_v34  ;;  %v2286_v2 = vpop.f32.mrb[41].mxu1 }
0x14ce   :  { %v2288_v22 = vpop.f32.mrb[42].mxu1  ;;  %v2287_v46 = vadd.f32 %v2286_v2, %v2183_v0 }
0x14cf   :  { %v2291_v28 = vmax.f32 %v2285_v48, 0.0  ;;  %v2289_v44 = vpop.f32.mrb[43].mxu1 }
0x14d0   :  { %v2292_v47 = vmax.f32 %v2287_v46, 0.0 }
0x14d1   :  { %v2302_v45 = vpack.c.bf16 %v2291_v28, %v2291_v28 }
0x14d3   :  { %2310 = vrot.lane.b32.xlu0 %v2302_v45, %s3206_s0 }
0x14d7   :  { %2402 = vrot.lane.b32.xlu0 %v2292_v47, %s3210_s17 }
0x1545   :  { %v2311_v51 = vpop.permute.xlu0 %2310 }
0x1546   :  { %2693 = vmatmul.mubr.msk.bf16.vlgmr.msra.gmra.mrb[36].mxu0 %vm240_vm3, %v2311_v51 }
0x1547   :  { %2712 = vmatprep.mubr.msk.bf16.mxu0 %vm3209_vm6, %v3207_v18  ;;  %2697 = vmatpush3.bf16.msra.mxu0 %v2834_v10 }
0x1548   :  { %2698 = vmatprep.subr.bf16.mxu0 %v3207_v18 }
0x1549   :  { %v2403_v7 = vpop.permute.xlu0 %2402 }
0x154b   :  { %2699 = vmatpush3.bf16.msra.mxu0 %v2835_v21 }
0x154c   :  { %2700 = vmatprep.subr.bf16.mxu0 %v3207_v18 }
0x154f   :  { %2701 = vmatpush3.bf16.msra.mxu0 %v2836_v12 }
0x1550   :  { %2702 = vmatprep.subr.bf16.mxu0 %v3207_v18 }
0x1553   :  { %2703 = vmatpush3.bf16.msra.mxu0 %v2837_v24 }
0x1554   :  { %2704 = vmatprep.subr.bf16.mxu0 %v3207_v18 }
0x1557   :  { %2705 = vmatpush3.bf16.msra.mxu0 %v2838_v54 }
0x1558   :  { %2706 = vmatprep.subr.bf16.mxu0 %v3207_v18 }
0x155b   :  { %2707 = vmatpush3.bf16.msra.mxu0 %v2839_v19 }
0x155c   :  { %2708 = vmatprep.subr.bf16.mxu0 %v3207_v18 }
0x155f   :  { %2709 = vmatpush3.bf16.msra.mxu0 %v2840_v1 }
0x1560   :  { %2710 = vmatprep.subr.bf16.mxu0 %v3207_v18 }
0x1563   :  { %2711 = vmatpush3.bf16.msra.mxu0 %v2841_v6 }
0x1619   :  { %v2373_v32 = vpop.f32.mrb[36].mxu0 }
0x161a   :  { %v2374_v23 = vadd.f32 %v2636_v31, %v2373_v32  ;;  %v2694_v25 = vpop.f32.mrb[37].mxu0 }
0x161b   :  { %v2376_v15 = vpop.f32.mrb[38].mxu0 }
0x161c   :  { %v2379_v58 = vmax.f32 %v2374_v23, 0.0  ;;  %v2695_v5 = vpop.f32.mrb[39].mxu0 }
0x161e   :  { %2398 = vrot.lane.b32.xlu1 %v2379_v58, %s3206_s0 }
0x1690   :  { %v2399_v52 = vpop.permute.xlu1 %2398 }
0x1691   :  { %v2405_v55 = vsel %vm240_vm3, %v2291_v28, %v2399_v52 }
0x1692   :  { %v2406_v18 = vsel %vm2246_vm9, %v2405_v55, %v2403_v7 }
0x1693   :  { %v2407_v8 = vpack.c.bf16 %v2406_v18, %v2406_v18 }
0x1695   :  { %2713 = vmatmul.mubr.bf16.vlgmr.msra.gmra.mrb[40].mxu0 %v2407_v8 }
0x1768   :  { %v2496_v16 = vpop.f32.mrb[40].mxu0 }
0x1769   :  { %v2497_v3 = vadd.f32 %v2642_v9, %v2496_v16  ;;  %v2714_v56 = vpop.f32.mrb[41].mxu0 }
0x176a   :  { %v2499_v50 = vpop.f32.mrb[42].mxu0 }
0x176b   :  { %2502 = vst [vmem:[#allocation5] sm:$0x3] %v2497_v3  ;;  %v2715_v13 = vpop.f32.mrb[43].mxu0 }
0x176c   :  { %3187 = shalt.err (!%p3184_p12)
}
0x176d   :  { %s3188_s3 = scalar_lea.hbm %s3857_s4, 32 }
0x176e   :  { %p3189_p13 = scmp.ne.s32.totalorder %s3857_s4, %s3188_s3  ;;  %p3192_p0 = scmp.lt.u32.totalorder %s3188_s3, %s3857_s4 }
0x1770   :  { %p3194_p1 = pnand %p3192_p0, %p3189_p13 }
0x1772   :  { %3197 = shalt.err (!%p3194_p1)
}
0x1773   :  { %2512 = dma.vmem_to_hbm [thread:$0]  %s2510_s23, 32, %s3857_s4, [#allocation4]  }
0x1774   :  { %3200 = dma.done.wait [#allocation4], 32  }
0x1775   :  { %3201 = vsyncadd [#allocation4], 4294967264 }
0x1776   :  { %2516 = vsyncpa [#allocation3], 1 }
0x1777   :  { %2517 = vsyncpa [#allocation4], 1 }

</bundles_post_ra>
